<compile_context>
chip_gen: v7x
topology: tpu7x:2x2x1
jax: 0.10.0
libtpu: 0.0.40
codegen_flags: <defaults>
</compile_context>

<pallas_src>
import jax
import jax.numpy as jnp
from jax.experimental import pallas as pl
from jax.experimental.pallas import tpu as pltpu

_HIDDEN = 512


def _round_up(x, m):
    return ((x + m - 1) // m) * m


def _discriminator_kernel(
    x_ref,            # (TILE_B, Dp)  bf16  batch tile of flattened input
    w1_ref, b1_ref,   # (Dp, 512) bf16, (1, 512) f32
    w2_ref, b2_ref,   # (512, 512) bf16, (1, 512) f32
    w3_ref, b3_ref,   # (512, 512) bf16, (1, 512) f32
    w4_ref,           # (1, 512) f32   final layer done as VPU reduce
    b4_ref,           # (1, 1)  f32    scalar in SMEM
    out_ref,          # (TILE_B, 1) f32
):
    def leaky_relu(v):
        # element-wise math kept in f32 (fast path on v5e as well)
        return jnp.where(v > 0, v, 0.2 * v)

    # Layer 1: Linear(Dp, 512) + LeakyReLU(0.2)   (bf16 MXU, f32 accumulate)
    h = jnp.dot(x_ref[...], w1_ref[...], preferred_element_type=jnp.float32)
    h = leaky_relu(h + b1_ref[...])

    # Layer 2: Linear(512, 512) + Dropout(identity, eval) + LeakyReLU(0.2)
    h = jnp.dot(h.astype(jnp.bfloat16), w2_ref[...],
                preferred_element_type=jnp.float32)
    h = leaky_relu(h + b2_ref[...])

    # Layer 3: Linear(512, 512) + Dropout(identity, eval) + LeakyReLU(0.2)
    h = jnp.dot(h.astype(jnp.bfloat16), w3_ref[...],
                preferred_element_type=jnp.float32)
    h = leaky_relu(h + b3_ref[...])

    # Layer 4: Linear(512, 1) + Sigmoid, as VPU multiply + XLU lane reduction
    # (avoids an N=1 MXU matmul and rides otherwise-idle VLIW slots).
    logit = jnp.sum(h * w4_ref[...], axis=-1, keepdims=True) + b4_ref[0, 0]
    out_ref[...] = jax.nn.sigmoid(logit).astype(out_ref.dtype)


def discriminator_forward(x_nchw, params):
    """x_nchw: (B, C, H, W) float32. Returns (B, 1) float32."""
    (w1, b1, w2, b2, w3, b3, w4, b4) = params
    B = x_nchw.shape[0]
    x_flat = x_nchw.reshape(B, -1)          # same semantics as torch view(B, -1)
    D = x_flat.shape[1]
    H = _HIDDEN

    # Lane/sublane-aligned padded sizes.
    Dp = _round_up(D, 128)
    TILE_B = min(512, _round_up(B, 16))     # multiple of 16 for bf16 sublanes
    Bp = _round_up(B, TILE_B)

    # Zero-pad input batch/feature dims and the matching rows of w1.
    x_p = jnp.pad(x_flat.astype(jnp.bfloat16), ((0, Bp - B), (0, Dp - D)))
    w1_p = jnp.pad(w1, ((0, Dp - D), (0, 0)))

    # Explicit VMEM budget (resident weights + double-buffered I/O tiles +
    # activation headroom), kept well under v7x's 64 MiB physical VMEM.
    weight_bytes = (Dp * H + 2 * H * H) * 2 + H * 4
    bias_bytes = 3 * H * 4 + 4
    io_bytes = 2 * (TILE_B * Dp * 2 + TILE_B * 4)   # double-buffered in/out
    act_bytes = 4 * TILE_B * H * 4
    vmem_limit = min(64 * 1024 * 1024,
                     max(8 * 1024 * 1024,
                         2 * (weight_bytes + bias_bytes + io_bytes + act_bytes)))

    grid = (Bp // TILE_B,)
    out = pl.pallas_call(
        _discriminator_kernel,
        out_shape=jax.ShapeDtypeStruct((Bp, 1), jnp.float32),
        grid=grid,
        in_specs=[
            pl.BlockSpec((TILE_B, Dp), lambda i: (i, 0)),     # x: batch-tiled
            pl.BlockSpec((Dp, H), lambda i: (0, 0)),          # w1: resident
            pl.BlockSpec((1, H), lambda i: (0, 0)),           # b1
            pl.BlockSpec((H, H), lambda i: (0, 0)),           # w2
            pl.BlockSpec((1, H), lambda i: (0, 0)),           # b2
            pl.BlockSpec((H, H), lambda i: (0, 0)),           # w3
            pl.BlockSpec((1, H), lambda i: (0, 0)),           # b3
            pl.BlockSpec((1, H), lambda i: (0, 0)),           # w4 row (f32)
            pl.BlockSpec(memory_space=pltpu.MemorySpace.SMEM),  # b4 scalar
        ],
        out_specs=pl.BlockSpec((TILE_B, 1), lambda i: (i, 0)),
        compiler_params=pltpu.CompilerParams(
            dimension_semantics=("parallel",),   # megacore sharding on v7x
            vmem_limit_bytes=vmem_limit,
        ),
    )(x_p, w1_p, b1, w2, b2, w3, b3, w4, b4)
    return out[:B]


def init_params(key, in_features, hidden=_HIDDEN):
    """Deterministic init mirroring nn.Linear's U(-1/sqrt(fan_in), 1/sqrt(fan_in))."""
    def linear(key, fan_in, fan_out):
        kw, kb = jax.random.split(key)
        bound = 1.0 / jnp.sqrt(fan_in)
        # stored as (in, out) == PyTorch weight.T
        w = jax.random.uniform(kw, (fan_in, fan_out), jnp.float32, -bound, bound)
        b = jax.random.uniform(kb, (1, fan_out), jnp.float32, -bound, bound)
        return w, b

    k1, k2, k3, k4 = jax.random.split(key, 4)
    w1, b1 = linear(k1, in_features, hidden)
    w2, b2 = linear(k2, hidden, hidden)
    w3, b3 = linear(k3, hidden, hidden)
    w4, b4 = linear(k4, hidden, 1)
    # MXU-facing weights stored in bf16 (halves HBM traffic, native MXU input);
    # biases in f32; final layer stored as a (1, 512) f32 row for the VPU reduce.
    return (w1.astype(jnp.bfloat16), b1,
            w2.astype(jnp.bfloat16), b2,
            w3.astype(jnp.bfloat16), b3,
            w4.T.astype(jnp.float32), b4)


def _reference(x_nchw, params):
    """Pure-JAX reference with the same bf16/f32 mixed precision as the kernel."""
    (w1, b1, w2, b2, w3, b3, w4, b4) = params

    def leaky(v):
        return jnp.where(v > 0, v, 0.2 * v)

    h = x_nchw.reshape(x_nchw.shape[0], -1).astype(jnp.bfloat16)
    h = leaky(jnp.dot(h, w1, preferred_element_type=jnp.float32) + b1)
    h = leaky(jnp.dot(h.astype(jnp.bfloat16), w2,
                      preferred_element_type=jnp.float32) + b2)
    h = leaky(jnp.dot(h.astype(jnp.bfloat16), w3,
                      preferred_element_type=jnp.float32) + b3)
    logit = jnp.sum(h * w4, axis=-1, keepdims=True) + b4[0, 0]
    return jax.nn.sigmoid(logit)


if __name__ == "__main__":
    # Small image shape consistent with the module: img_shape = (C, H, W) = (1, 16, 16)
    B, C, H_img, W_img = 2, 1, 16, 16
    D = C * H_img * W_img

    key = jax.random.PRNGKey(0)
    kx, kp = jax.random.split(key)
    x = jax.random.normal(kx, (B, C, H_img, W_img), dtype=jnp.float32)
    params = init_params(kp, D)

    out = discriminator_forward(x, params)
    out = jax.block_until_ready(out)

    expected = _reference(x, params)
    assert out.shape == (B, 1), out.shape
    assert jnp.allclose(out, expected, atol=1e-4, rtol=1e-4), (
        "mismatch vs JAX reference; max abs err = "
        f"{float(jnp.max(jnp.abs(out - expected)))}")
    print("KERNEL_OK")
</pallas_src>

<mosaic_0001>
module attributes {stable_mosaic.version = 11 : i64} {
  func.func @_discriminator_kernel(%arg0: i32, %arg1: memref<16x256xbf16, #tpu.memory_space<vmem>>, %arg2: memref<256x512xbf16, #tpu.memory_space<vmem>>, %arg3: memref<1x512xf32, #tpu.memory_space<vmem>>, %arg4: memref<512x512xbf16, #tpu.memory_space<vmem>>, %arg5: memref<1x512xf32, #tpu.memory_space<vmem>>, %arg6: memref<512x512xbf16, #tpu.memory_space<vmem>>, %arg7: memref<1x512xf32, #tpu.memory_space<vmem>>, %arg8: memref<1x512xf32, #tpu.memory_space<vmem>>, %arg9: memref<1x1xf32, #tpu.memory_space<smem>>, %arg10: memref<16x1xf32, #tpu.memory_space<vmem>>) attributes {dimension_semantics = [#tpu.dimension_semantics<parallel>], iteration_bounds = array<i64: 1>, scalar_prefetch = 0 : i64, scratch_operands = 0 : i64, tpu.core_type = #tpu.core_type<tc>, window_params = [{transform_indices = @transform_0, window_bounds = array<i64: 16, 256>}, {pipeline_mode = #tpu.pipeline_mode<synchronous>, transform_indices = @transform_1, window_bounds = array<i64: 256, 512>}, {pipeline_mode = #tpu.pipeline_mode<synchronous>, transform_indices = @transform_2, window_bounds = array<i64: 1, 512>}, {pipeline_mode = #tpu.pipeline_mode<synchronous>, transform_indices = @transform_3, window_bounds = array<i64: 512, 512>}, {pipeline_mode = #tpu.pipeline_mode<synchronous>, transform_indices = @transform_4, window_bounds = array<i64: 1, 512>}, {pipeline_mode = #tpu.pipeline_mode<synchronous>, transform_indices = @transform_5, window_bounds = array<i64: 512, 512>}, {pipeline_mode = #tpu.pipeline_mode<synchronous>, transform_indices = @transform_6, window_bounds = array<i64: 1, 512>}, {pipeline_mode = #tpu.pipeline_mode<synchronous>, transform_indices = @transform_7, window_bounds = array<i64: 1, 512>}, {transform_indices = @transform_8, window_bounds = array<i64: 1, 1>}, {transform_indices = @transform_9, window_bounds = array<i64: 16, 1>}]} {
    %c0 = arith.constant 0 : index
    %c0_0 = arith.constant 0 : index
    %0 = vector.load %arg1[%c0, %c0_0] : memref<16x256xbf16, #tpu.memory_space<vmem>>, vector<16x256xbf16>
    %c0_1 = arith.constant 0 : index
    %c0_2 = arith.constant 0 : index
    %1 = vector.load %arg2[%c0_1, %c0_2] : memref<256x512xbf16, #tpu.memory_space<vmem>>, vector<256x512xbf16>
    %cst = arith.constant dense<0.000000e+00> : vector<16x512xf32>
    %2 = tpu.matmul %0, %1, %cst {dimension_numbers = #tpu.dot_dimension_numbers<[1], [0], [0], [1], [0, 0, 1, 1], [], []>} : vector<16x256xbf16>, vector<256x512xbf16>, vector<16x512xf32> -> vector<16x512xf32>
    %c0_3 = arith.constant 0 : index
    %c0_4 = arith.constant 0 : index
    %3 = vector.load %arg3[%c0_3, %c0_4] : memref<1x512xf32, #tpu.memory_space<vmem>>, vector<1x512xf32>
    %4 = vector.broadcast %3 : vector<1x512xf32> to vector<16x512xf32>
    %5 = arith.addf %2, %4 : vector<16x512xf32>
    %cst_5 = arith.constant 0.000000e+00 : f32
    %6 = vector.broadcast %cst_5 : f32 to vector<16x512xf32>
    %7 = arith.cmpf ogt, %5, %6 : vector<16x512xf32>
    %cst_6 = arith.constant 2.000000e-01 : f32
    %8 = vector.broadcast %cst_6 : f32 to vector<16x512xf32>
    %9 = arith.mulf %8, %5 : vector<16x512xf32>
    %10 = arith.select %7, %5, %9 : vector<16x512xi1>, vector<16x512xf32>
    %11 = arith.truncf %10 : vector<16x512xf32> to vector<16x512xbf16>
    %c0_7 = arith.constant 0 : index
    %c0_8 = arith.constant 0 : index
    %12 = vector.load %arg4[%c0_7, %c0_8] : memref<512x512xbf16, #tpu.memory_space<vmem>>, vector<512x512xbf16>
    %cst_9 = arith.constant dense<0.000000e+00> : vector<16x512xf32>
    %13 = tpu.matmul %11, %12, %cst_9 {dimension_numbers = #tpu.dot_dimension_numbers<[1], [0], [0], [1], [0, 0, 1, 1], [], []>} : vector<16x512xbf16>, vector<512x512xbf16>, vector<16x512xf32> -> vector<16x512xf32>
    %c0_10 = arith.constant 0 : index
    %c0_11 = arith.constant 0 : index
    %14 = vector.load %arg5[%c0_10, %c0_11] : memref<1x512xf32, #tpu.memory_space<vmem>>, vector<1x512xf32>
    %15 = vector.broadcast %14 : vector<1x512xf32> to vector<16x512xf32>
    %16 = arith.addf %13, %15 : vector<16x512xf32>
    %cst_12 = arith.constant 0.000000e+00 : f32
    %17 = vector.broadcast %cst_12 : f32 to vector<16x512xf32>
    %18 = arith.cmpf ogt, %16, %17 : vector<16x512xf32>
    %cst_13 = arith.constant 2.000000e-01 : f32
    %19 = vector.broadcast %cst_13 : f32 to vector<16x512xf32>
    %20 = arith.mulf %19, %16 : vector<16x512xf32>
    %21 = arith.select %18, %16, %20 : vector<16x512xi1>, vector<16x512xf32>
    %22 = arith.truncf %21 : vector<16x512xf32> to vector<16x512xbf16>
    %c0_14 = arith.constant 0 : index
    %c0_15 = arith.constant 0 : index
    %23 = vector.load %arg6[%c0_14, %c0_15] : memref<512x512xbf16, #tpu.memory_space<vmem>>, vector<512x512xbf16>
    %cst_16 = arith.constant dense<0.000000e+00> : vector<16x512xf32>
    %24 = tpu.matmul %22, %23, %cst_16 {dimension_numbers = #tpu.dot_dimension_numbers<[1], [0], [0], [1], [0, 0, 1, 1], [], []>} : vector<16x512xbf16>, vector<512x512xbf16>, vector<16x512xf32> -> vector<16x512xf32>
    %c0_17 = arith.constant 0 : index
    %c0_18 = arith.constant 0 : index
    %25 = vector.load %arg7[%c0_17, %c0_18] : memref<1x512xf32, #tpu.memory_space<vmem>>, vector<1x512xf32>
    %26 = vector.broadcast %25 : vector<1x512xf32> to vector<16x512xf32>
    %27 = arith.addf %24, %26 : vector<16x512xf32>
    %cst_19 = arith.constant 0.000000e+00 : f32
    %28 = vector.broadcast %cst_19 : f32 to vector<16x512xf32>
    %29 = arith.cmpf ogt, %27, %28 : vector<16x512xf32>
    %cst_20 = arith.constant 2.000000e-01 : f32
    %30 = vector.broadcast %cst_20 : f32 to vector<16x512xf32>
    %31 = arith.mulf %30, %27 : vector<16x512xf32>
    %32 = arith.select %29, %27, %31 : vector<16x512xi1>, vector<16x512xf32>
    %c0_21 = arith.constant 0 : index
    %c0_22 = arith.constant 0 : index
    %33 = vector.load %arg8[%c0_21, %c0_22] : memref<1x512xf32, #tpu.memory_space<vmem>>, vector<1x512xf32>
    %34 = vector.broadcast %33 : vector<1x512xf32> to vector<16x512xf32>
    %35 = arith.mulf %32, %34 : vector<16x512xf32>
    %cst_23 = arith.constant dense<0.000000e+00> : vector<16xf32>
    %36 = vector.multi_reduction <add>, %35, %cst_23 [1] : vector<16x512xf32> to vector<16xf32>
    %37 = vector.shape_cast %36 : vector<16xf32> to vector<16x1xf32>
    %c0_24 = arith.constant 0 : index
    %c0_25 = arith.constant 0 : index
    %38 = memref.load %arg9[%c0_24, %c0_25] : memref<1x1xf32, #tpu.memory_space<smem>>
    %39 = vector.broadcast %38 : f32 to vector<16x1xf32>
    %40 = arith.addf %37, %39 : vector<16x1xf32>
    %41 = arith.negf %40 : vector<16x1xf32>
    %42 = math.exp %41 : vector<16x1xf32>
    %cst_26 = arith.constant 1.000000e+00 : f32
    %43 = vector.broadcast %cst_26 : f32 to vector<16x1xf32>
    %44 = arith.addf %43, %42 : vector<16x1xf32>
    %45 = arith.divf %43, %44 : vector<16x1xf32>
    %c0_27 = arith.constant 0 : index
    %c0_28 = arith.constant 0 : index
    %46 = vector.load %arg10[%c0_27, %c0_28] : memref<16x1xf32, #tpu.memory_space<vmem>>, vector<16x1xf32>
    tpu.vector_store %arg10[%c0_27, %c0_28], %45 {strides = array<i32>} : memref<16x1xf32, #tpu.memory_space<vmem>>, vector<16x1xf32>,
    return
  }
  func.func @transform_0(%arg0: i32) -> (i32, i32) {
    %c0_i32 = arith.constant 0 : i32
    %c0_i32_0 = arith.constant 0 : i32
    return %arg0, %c0_i32 : i32, i32
  }
  func.func @transform_1(%arg0: i32) -> (i32, i32) {
    %c0_i32 = arith.constant 0 : i32
    %c0_i32_0 = arith.constant 0 : i32
    %c0_i32_1 = arith.constant 0 : i32
    return %c0_i32, %c0_i32_0 : i32, i32
  }
  func.func @transform_2(%arg0: i32) -> (i32, i32) {
    %c0_i32 = arith.constant 0 : i32
    %c0_i32_0 = arith.constant 0 : i32
    %c0_i32_1 = arith.constant 0 : i32
    return %c0_i32, %c0_i32_0 : i32, i32
  }
  func.func @transform_3(%arg0: i32) -> (i32, i32) {
    %c0_i32 = arith.constant 0 : i32
    %c0_i32_0 = arith.constant 0 : i32
    %c0_i32_1 = arith.constant 0 : i32
    return %c0_i32, %c0_i32_0 : i32, i32
  }
  func.func @transform_4(%arg0: i32) -> (i32, i32) {
    %c0_i32 = arith.constant 0 : i32
    %c0_i32_0 = arith.constant 0 : i32
    %c0_i32_1 = arith.constant 0 : i32
    return %c0_i32, %c0_i32_0 : i32, i32
  }
  func.func @transform_5(%arg0: i32) -> (i32, i32) {
    %c0_i32 = arith.constant 0 : i32
    %c0_i32_0 = arith.constant 0 : i32
    %c0_i32_1 = arith.constant 0 : i32
    return %c0_i32, %c0_i32_0 : i32, i32
  }
  func.func @transform_6(%arg0: i32) -> (i32, i32) {
    %c0_i32 = arith.constant 0 : i32
    %c0_i32_0 = arith.constant 0 : i32
    %c0_i32_1 = arith.constant 0 : i32
    return %c0_i32, %c0_i32_0 : i32, i32
  }
  func.func @transform_7(%arg0: i32) -> (i32, i32) {
    %c0_i32 = arith.constant 0 : i32
    %c0_i32_0 = arith.constant 0 : i32
    %c0_i32_1 = arith.constant 0 : i32
    return %c0_i32, %c0_i32_0 : i32, i32
  }
  func.func @transform_8(%arg0: i32) -> (i32, i32) {
    %c0_i32 = arith.constant 0 : i32
    %c0_i32_0 = arith.constant 0 : i32
    %c0_i32_1 = arith.constant 0 : i32
    return %c0_i32, %c0_i32_0 : i32, i32
  }
  func.func @transform_9(%arg0: i32) -> (i32, i32) {
    %c0_i32 = arith.constant 0 : i32
    %c0_i32_0 = arith.constant 0 : i32
    return %arg0, %c0_i32 : i32, i32
  }
}

</mosaic_0001>

<bundles_post_ra>
// kernel: tpu_custom_call.1
= control target key start
LH: loop header
LB: loop body
LE: loop exit
PB: predicated region body
PF: predicated region fallthrough
CT: control target
= control target key end

     0   :  { %15 = vsyncpa [#allocation4], 0  ;;  %s3790_s0 = inlined_call_operand.hbm [shape: bf16[16,256], index: 0, kind: input, shape index: {}]   ;;  %s3791_s1 = inlined_call_operand.hbm [shape: bf16[256,512], index: 1, kind: input, shape index: {}]   ;;  %s3792_s2 = inlined_call_operand.vmem [shape: f32[1,512], index: 2, kind: input, shape index: {}]   ;;  %s3793_s3 = inlined_call_operand.hbm [shape: bf16[512,512], index: 3, kind: input, shape index: {}]   ;;  %s3794_s4 = inlined_call_operand.vmem [shape: f32[1,512], index: 4, kind: input, shape index: {}]   ;;  %s3795_s5 = inlined_call_operand.hbm [shape: bf16[512,512], index: 5, kind: input, shape index: {}]   ;;  %s3796_s6 = inlined_call_operand.vmem [shape: f32[1,512], index: 6, kind: input, shape index: {}]   ;;  %s3797_s7 = inlined_call_operand.vmem [shape: f32[1,512], index: 7, kind: input, shape index: {}]   ;;  %s3798_s8 = inlined_call_operand.<no memory space> [shape: f32[1,1], index: 8, kind: input, shape index: {}]   ;;  %s3799_s9 = inlined_call_operand.vmem [shape: f32[16,1], index: 9, kind: output, shape index: {}]  }
   0x1   :  { %16 = vsyncpa [#allocation6], 0 }
   0x2   :  { %17 = vsyncpa [#allocation9], 0  ;;  %s3611_s30 = smov [#allocation5]   ;;  %s3517_s13 = scalar_lea.hbm %s3791_s1, 8192 }
   0x3   :  { %s35_s10 = sshll.u32 %s3611_s30, 4  ;;  %p3518_p0 = scmp.ne.s32.totalorder %s3791_s1, %s3517_s13  ;;  %s36_s10 = int_to_ptr.vmem [resolvable:$true] %s35_s10 }
   0x4   :  { %p3521_p1 = scmp.lt.u32.totalorder %s3517_s13, %s3791_s1 }
   0x6   :  { %p3523_p2 = pnand %p3521_p1, %p3518_p0 }
   0x8   :  { %3526 = shalt.err (!%p3523_p2)
}
   0x9   :  { %s3527_s18 = scalar_lea.vmem %s36_s10, 8192  ;;  %p3532_p4 = scmp.lt.s32.totalorder %s36_s10, %s36_s10 }
   0xa   :  { %p3528_p3 = scmp.ne.s32.totalorder %s36_s10, %s3527_s18  ;;  %p3533_p5 = scmp.lt.s32.totalorder %s3527_s18, %s3527_s18 }
   0xc   :  { %p3534_p6 = por %p3533_p5, %p3532_p4 }
   0xe   :  { %p3535_p7 = pnand %p3534_p6, %p3528_p3 }
  0x10   :  { %3538 = shalt.err (!%p3535_p7)
}
  0x11   :  { %s3612_s19 = smov 256   ;;  %s3613_s20 = smov 16  }
  0x12   :  { %41 = dma.hbm_to_vmem [thread:$0]  %s3791_s1, 8192, %s36_s10, [#allocation6], %s3612_s19, %s3612_s19, %s3613_s20  }
  0x13   :  { %s3614_s23 = smov [#allocation3]   ;;  %s3539_s27 = scalar_lea.hbm %s3790_s0, 256 }
  0x14   :  { %s23_s24 = sshll.u32 %s3614_s23, 4  ;;  %p3540_p8 = scmp.ne.s32.totalorder %s3790_s0, %s3539_s27  ;;  %s24_s24 = int_to_ptr.vmem [resolvable:$true] %s23_s24 }
  0x15   :  { %p3543_p9 = scmp.lt.u32.totalorder %s3539_s27, %s3790_s0 }
  0x17   :  { %p3545_p10 = pnand %p3543_p9, %p3540_p8 }
  0x19   :  { %3548 = shalt.err (!%p3545_p10)
}
  0x1a   :  { %s3549_s12 = scalar_lea.vmem %s24_s24, 256  ;;  %p3554_p12 = scmp.lt.s32.totalorder %s24_s24, %s24_s24 }
  0x1b   :  { %p3550_p11 = scmp.ne.s32.totalorder %s24_s24, %s3549_s12  ;;  %p3555_p13 = scmp.lt.s32.totalorder %s3549_s12, %s3549_s12 }
  0x1d   :  { %p3556_p0 = por %p3555_p13, %p3554_p12 }
  0x1f   :  { %p3557_p1 = pnand %p3556_p0, %p3550_p11 }
  0x21   :  { %3560 = shalt.err (!%p3557_p1)
}
  0x22   :  { %s3615_s1 = smov 128   ;;  %s3616_s10 = smov 8  }
  0x23   :  { %29 = dma.hbm_to_vmem [thread:$0]  %s3790_s0, 256, %s24_s24, [#allocation4], %s3615_s1, %s3615_s1, %s3616_s10  }
  0x24   :  { %s3617_s15 = smov [#allocation7]   ;;  %s3618_s17 = smov [#allocation8]  }
  0x25   :  { %s49_s16 = sshll.u32 %s3617_s15, 4  ;;  %s63_s18 = sshll.u32 %s3618_s17, 4  ;;  %s50_s16 = int_to_ptr.vmem [resolvable:$true] %s49_s16  ;;  %s3696_s18 = int_to_ptr.vmem [resolvable:$true] %s63_s18 }
  0x26   :  { %s3561_s23 = scalar_lea.hbm %s3793_s3, 16384 }
  0x27   :  { %p3562_p2 = scmp.ne.s32.totalorder %s3793_s3, %s3561_s23  ;;  %p3565_p3 = scmp.lt.u32.totalorder %s3561_s23, %s3793_s3 }
  0x29   :  { %p3567_p4 = pnand %p3565_p3, %p3562_p2 }
  0x2b   :  { %3570 = shalt.err (!%p3567_p4)
}
  0x2c   :  { %s3571_s0 = scalar_lea.vmem %s50_s16, 16384  ;;  %p3576_p6 = scmp.lt.s32.totalorder %s50_s16, %s50_s16 }
  0x2d   :  { %p3572_p5 = scmp.ne.s32.totalorder %s50_s16, %s3571_s0  ;;  %p3577_p7 = scmp.lt.s32.totalorder %s3571_s0, %s3571_s0 }
  0x2f   :  { %p3578_p8 = por %p3577_p7, %p3576_p6 }
  0x31   :  { %p3579_p9 = pnand %p3578_p8, %p3572_p5 }
  0x33   :  { %3582 = shalt.err (!%p3579_p9)
}
  0x34   :  { %55 = dma.hbm_to_vmem [thread:$0]  %s3793_s3, 16384, %s50_s16, [#allocation6], %s3612_s19, %s3612_s19, %s3613_s20  }
  0x35   :  { %s3583_s12 = scalar_lea.hbm %s3795_s5, 16384 }
  0x36   :  { %p3584_p10 = scmp.ne.s32.totalorder %s3795_s5, %s3583_s12  ;;  %p3587_p11 = scmp.lt.u32.totalorder %s3583_s12, %s3795_s5 }
  0x38   :  { %p3589_p12 = pnand %p3587_p11, %p3584_p10 }
  0x3a   :  { %3592 = shalt.err (!%p3589_p12)
}
  0x3b   :  { %s3593_s15 = scalar_lea.vmem %s3696_s18, 16384  ;;  %p3598_p0 = scmp.lt.s32.totalorder %s3696_s18, %s3696_s18 }
  0x3c   :  { %p3594_p13 = scmp.ne.s32.totalorder %s3696_s18, %s3593_s15  ;;  %p3599_p1 = scmp.lt.s32.totalorder %s3593_s15, %s3593_s15 }
  0x3e   :  { %p3600_p2 = por %p3599_p1, %p3598_p0 }
  0x40   :  { %p3601_p3 = pnand %p3600_p2, %p3594_p13 }
  0x42   :  { %3604 = shalt.err (!%p3601_p3)
}
  0x43   :  { %69 = dma.hbm_to_vmem [thread:$0]  %s3795_s5, 16384, %s3696_s18, [#allocation9], %s3612_s19, %s3612_s19, %s3613_s20  }
  0x44   :  { %3605 = dma.done.wait [#allocation4], 256  }
  0x45   :  { %3606 = vsyncadd [#allocation4], 4294967040 }
  0x46   :  { %3607 = dma.done.wait [#allocation6], 24576  }
  0x47   :  { %3608 = vsyncadd [#allocation6], 4294942720 }
  0x48   :  { %3609 = dma.done.wait [#allocation9], 16384  }
  0x49   :  { %3610 = vsyncadd [#allocation9], 4294950912  ;;  %v3026_v0 = vld [vmem:[#allocation5 + $0x4] ss:$16 sps:$4 sm:$0xff]   ;;  %v3028_v1 = vld [vmem:[#allocation5] ss:$16 sps:$4 sm:$0xff]  }
  0x4a   :  { %506 = vmatprep.subr.bf16.mxu0 %v3026_v0  ;;  %v3029_v2 = vld [vmem:[#allocation5 + $0x24] ss:$16 sps:$4 sm:$0xff]   ;;  %v3031_v3 = vld [vmem:[#allocation5 + $0x20] ss:$16 sps:$4 sm:$0xff]   ;;  %v3071_v13 = vld [vmem:[#allocation5 + $0xc] ss:$16 sps:$4 sm:$0xff]  }
  0x4b   :  { %507 = vmatpush1.bf16.msra.mxu0 %v3028_v1  ;;  %v3032_v4 = vld [vmem:[#allocation5 + $0x44] ss:$16 sps:$4 sm:$0xff]   ;;  %v3034_v5 = vld [vmem:[#allocation5 + $0x40] ss:$16 sps:$4 sm:$0xff]   ;;  %v3073_v14 = vld [vmem:[#allocation5 + $0x8] ss:$16 sps:$4 sm:$0xff]   ;;  %549 = vmatprep.subr.bf16.mxu1 %v3071_v13 }
  0x4c   :  { %508 = vmatprep.subr.bf16.mxu0 %v3029_v2  ;;  %v3035_v6 = vld [vmem:[#allocation5 + $0x64] ss:$16 sps:$4 sm:$0xff]   ;;  %v3037_v7 = vld [vmem:[#allocation5 + $0x60] ss:$16 sps:$4 sm:$0xff]   ;;  %550 = vmatpush1.bf16.msra.mxu1 %v3073_v14  ;;  %v3077_v16 = vld [vmem:[#allocation5 + $0x2c] ss:$16 sps:$4 sm:$0xff]  }
  0x4d   :  { %v3038_v8 = vld [vmem:[#allocation5 + $0x84] ss:$16 sps:$4 sm:$0xff]   ;;  %v3040_v9 = vld [vmem:[#allocation5 + $0x80] ss:$16 sps:$4 sm:$0xff]   ;;  %551 = vmatprep.subr.bf16.mxu1 %v3077_v16  ;;  %v3082_v19 = vld [vmem:[#allocation5 + $0x28] ss:$16 sps:$4 sm:$0xff]  }
  0x4e   :  { %v3041_v10 = vld [vmem:[#allocation5 + $0xa4] ss:$16 sps:$4 sm:$0xff]   ;;  %v3043_v11 = vld [vmem:[#allocation5 + $0xa0] ss:$16 sps:$4 sm:$0xff]   ;;  %v3083_v21 = vld [vmem:[#allocation5 + $0x4c] ss:$16 sps:$4 sm:$0xff]  }
  0x4f   :  { %509 = vmatpush1.bf16.msra.mxu0 %v3031_v3  ;;  %v3044_v12 = vld [vmem:[#allocation5 + $0xc4] ss:$16 sps:$4 sm:$0xff]   ;;  %v3046_v15 = vld [vmem:[#allocation5 + $0xc0] ss:$16 sps:$4 sm:$0xff]   ;;  %v3085_v23 = vld [vmem:[#allocation5 + $0x48] ss:$16 sps:$4 sm:$0xff]  }
  0x50   :  { %510 = vmatprep.subr.bf16.mxu0 %v3032_v4  ;;  %v3047_v17 = vld [vmem:[#allocation5 + $0xe4] ss:$16 sps:$4 sm:$0xff]   ;;  %v3049_v20 = vld [vmem:[#allocation5 + $0xe0] ss:$16 sps:$4 sm:$0xff]   ;;  %552 = vmatpush1.bf16.msra.mxu1 %v3082_v19  ;;  %v3086_v24 = vld [vmem:[#allocation5 + $0x6c] ss:$16 sps:$4 sm:$0xff]  }
  0x51   :  { %v3081_v18 = vld [vmem:[#allocation3 + $0x4] ss:$8 sps:$4 sm:$0xff]   ;;  %553 = vmatprep.subr.bf16.mxu1 %v3083_v21  ;;  %v3052_v25 = vld [vmem:[#allocation5 + $0x100] ss:$16 sps:$4 sm:$0xff]   ;;  %v3088_v27 = vld [vmem:[#allocation5 + $0x68] ss:$16 sps:$4 sm:$0xff]  }
  0x52   :  { %538 = vmatprep.mubr.bf16.mxu0 %v3081_v18  ;;  %581 = vmatprep.mubr.bf16.mxu1 %v3081_v18  ;;  %v3050_v22 = vld [vmem:[#allocation5 + $0x104] ss:$16 sps:$4 sm:$0xff]   ;;  %v3089_v28 = vld [vmem:[#allocation5 + $0x8c] ss:$16 sps:$4 sm:$0xff]   ;;  %v3055_v29 = vld [vmem:[#allocation5 + $0x120] ss:$16 sps:$4 sm:$0xff]  }
  0x53   :  { %511 = vmatpush1.bf16.msra.mxu0 %v3034_v5  ;;  %v3053_v26 = vld [vmem:[#allocation5 + $0x124] ss:$16 sps:$4 sm:$0xff]   ;;  %v3091_v31 = vld [vmem:[#allocation5 + $0x88] ss:$16 sps:$4 sm:$0xff]   ;;  %v3092_v32 = vld [vmem:[#allocation5 + $0xac] ss:$16 sps:$4 sm:$0xff]  }
  0x54   :  { %512 = vmatprep.subr.bf16.mxu0 %v3035_v6  ;;  %554 = vmatpush1.bf16.msra.mxu1 %v3085_v23  ;;  %v3056_v30 = vld [vmem:[#allocation5 + $0x144] ss:$16 sps:$4 sm:$0xff]   ;;  %v3058_v33 = vld [vmem:[#allocation5 + $0x140] ss:$16 sps:$4 sm:$0xff]   ;;  %v3094_v35 = vld [vmem:[#allocation5 + $0xa8] ss:$16 sps:$4 sm:$0xff]  }
  0x55   :  { %555 = vmatprep.subr.bf16.mxu1 %v3086_v24  ;;  %v3059_v34 = vld [vmem:[#allocation5 + $0x164] ss:$16 sps:$4 sm:$0xff]   ;;  %v3095_v36 = vld [vmem:[#allocation5 + $0xcc] ss:$16 sps:$4 sm:$0xff]   ;;  %v3061_v37 = vld [vmem:[#allocation5 + $0x160] ss:$16 sps:$4 sm:$0xff]  }
  0x56   :  { %v3062_v38 = vld [vmem:[#allocation5 + $0x184] ss:$16 sps:$4 sm:$0xff]   ;;  %v3097_v39 = vld [vmem:[#allocation5 + $0xc8] ss:$16 sps:$4 sm:$0xff]   ;;  %v3098_v40 = vld [vmem:[#allocation5 + $0xec] ss:$16 sps:$4 sm:$0xff]  }
  0x57   :  { %513 = vmatpush1.bf16.msra.mxu0 %v3037_v7  ;;  %v3064_v41 = vld [vmem:[#allocation5 + $0x180] ss:$16 sps:$4 sm:$0xff]   ;;  %v3065_v42 = vld [vmem:[#allocation5 + $0x1a4] ss:$16 sps:$4 sm:$0xff]   ;;  %v3100_v43 = vld [vmem:[#allocation5 + $0xe8] ss:$16 sps:$4 sm:$0xff]  }
  0x58   :  { %514 = vmatprep.subr.bf16.mxu0 %v3038_v8  ;;  %556 = vmatpush1.bf16.msra.mxu1 %v3088_v27  ;;  %v3101_v44 = vld [vmem:[#allocation5 + $0x10c] ss:$16 sps:$4 sm:$0xff]   ;;  %v3067_v45 = vld [vmem:[#allocation5 + $0x1a0] ss:$16 sps:$4 sm:$0xff]   ;;  %v3068_v46 = vld [vmem:[#allocation5 + $0x1c4] ss:$16 sps:$4 sm:$0xff]  }
  0x59   :  { %557 = vmatprep.subr.bf16.mxu1 %v3089_v28  ;;  %v3103_v47 = vld [vmem:[#allocation5 + $0x108] ss:$16 sps:$4 sm:$0xff]   ;;  %v3104_v48 = vld [vmem:[#allocation5 + $0x12c] ss:$16 sps:$4 sm:$0xff]   ;;  %v3070_v49 = vld [vmem:[#allocation5 + $0x1c0] ss:$16 sps:$4 sm:$0xff]  }
  0x5a   :  { %v3074_v50 = vld [vmem:[#allocation5 + $0x1e4] ss:$16 sps:$4 sm:$0xff]   ;;  %v3106_v51 = vld [vmem:[#allocation5 + $0x128] ss:$16 sps:$4 sm:$0xff]   ;;  %v3107_v52 = vld [vmem:[#allocation5 + $0x14c] ss:$16 sps:$4 sm:$0xff]  }
  0x5b   :  { %515 = vmatpush1.bf16.msra.mxu0 %v3040_v9  ;;  %v3076_v53 = vld [vmem:[#allocation5 + $0x1e0] ss:$16 sps:$4 sm:$0xff]   ;;  %v3109_v54 = vld [vmem:[#allocation5 + $0x148] ss:$16 sps:$4 sm:$0xff]   ;;  %v3110_v55 = vld [vmem:[#allocation5 + $0x16c] ss:$16 sps:$4 sm:$0xff]  }
  0x5c   :  { %516 = vmatprep.subr.bf16.mxu0 %v3041_v10  ;;  %558 = vmatpush1.bf16.msra.mxu1 %v3091_v31  ;;  %v3127_v56 = vld [vmem:[#allocation7 + $0x4] ss:$16 sps:$4 sm:$0xff]   ;;  %v3079_v57 = vld [vmem:[#allocation3] ss:$8 sps:$4 sm:$0xff]   ;;  %v3113_v59 = vld [vmem:[#allocation5 + $0x18c] ss:$16 sps:$4 sm:$0xff]  }
  0x5d   :  { %559 = vmatprep.subr.bf16.mxu1 %v3092_v32  ;;  %v3112_v58 = vld [vmem:[#allocation5 + $0x168] ss:$16 sps:$4 sm:$0xff]   ;;  %v3125_v60 = vld [vmem:[#allocation7] ss:$16 sps:$4 sm:$0xff]   ;;  %v3133_v61 = vld [vmem:[#allocation7 + $0x24] ss:$16 sps:$4 sm:$0xff]  }
  0x5e   :  { %v3115_v62 = vld [vmem:[#allocation5 + $0x188] ss:$16 sps:$4 sm:$0xff]   ;;  %v3116_v63 = vld [vmem:[#allocation5 + $0x1ac] ss:$16 sps:$4 sm:$0xff]   ;;  %v3131_v0 = vld [vmem:[#allocation7 + $0x20] ss:$16 sps:$4 sm:$0xff]  }
  0x5f   :  { %517 = vmatpush1.bf16.msra.mxu0 %v3043_v11  ;;  %v3139_v1 = vld [vmem:[#allocation7 + $0x44] ss:$16 sps:$4 sm:$0xff]   ;;  %v3118_v2 = vld [vmem:[#allocation5 + $0x1a8] ss:$16 sps:$4 sm:$0xff]   ;;  %v3119_v3 = vld [vmem:[#allocation5 + $0x1cc] ss:$16 sps:$4 sm:$0xff]  }
  0x60   :  { %518 = vmatprep.subr.bf16.mxu0 %v3044_v12  ;;  %560 = vmatpush1.bf16.msra.mxu1 %v3094_v35  ;;  %v3137_v4 = vld [vmem:[#allocation7 + $0x40] ss:$16 sps:$4 sm:$0xff]   ;;  %v3145_v5 = vld [vmem:[#allocation7 + $0x64] ss:$16 sps:$4 sm:$0xff]   ;;  %v3121_v6 = vld [vmem:[#allocation5 + $0x1c8] ss:$16 sps:$4 sm:$0xff]  }
  0x61   :  { %561 = vmatprep.subr.bf16.mxu1 %v3095_v36  ;;  %v3122_v7 = vld [vmem:[#allocation5 + $0x1ec] ss:$16 sps:$4 sm:$0xff]   ;;  %v3143_v8 = vld [vmem:[#allocation7 + $0x60] ss:$16 sps:$4 sm:$0xff]   ;;  %v3151_v9 = vld [vmem:[#allocation7 + $0x84] ss:$16 sps:$4 sm:$0xff]  }
  0x62   :  { %v3124_v10 = vld [vmem:[#allocation5 + $0x1e8] ss:$16 sps:$4 sm:$0xff]   ;;  %v3130_v11 = vld [vmem:[#allocation7 + $0xc] ss:$16 sps:$4 sm:$0xff]   ;;  %v3149_v12 = vld [vmem:[#allocation7 + $0x80] ss:$16 sps:$4 sm:$0xff]  }
  0x63   :  { %519 = vmatpush1.bf16.msra.mxu0 %v3046_v15  ;;  %v3157_v13 = vld [vmem:[#allocation7 + $0xa4] ss:$16 sps:$4 sm:$0xff]   ;;  %v3128_v14 = vld [vmem:[#allocation7 + $0x8] ss:$16 sps:$4 sm:$0xff]   ;;  %v3155_v15 = vld [vmem:[#allocation7 + $0xa0] ss:$16 sps:$4 sm:$0xff]  }
  0x64   :  { %520 = vmatprep.subr.bf16.mxu0 %v3047_v17  ;;  %562 = vmatpush1.bf16.msra.mxu1 %v3097_v39  ;;  %v3136_v16 = vld [vmem:[#allocation7 + $0x2c] ss:$16 sps:$4 sm:$0xff]   ;;  %v3163_v17 = vld [vmem:[#allocation7 + $0xc4] ss:$16 sps:$4 sm:$0xff]   ;;  %v3134_v18 = vld [vmem:[#allocation7 + $0x28] ss:$16 sps:$4 sm:$0xff]  }
  0x65   :  { %563 = vmatprep.subr.bf16.mxu1 %v3098_v40  ;;  %v3161_v19 = vld [vmem:[#allocation7 + $0xc0] ss:$16 sps:$4 sm:$0xff]   ;;  %v3169_v21 = vld [vmem:[#allocation7 + $0xe4] ss:$16 sps:$4 sm:$0xff]   ;;  %v3148_v24 = vld [vmem:[#allocation7 + $0x6c] ss:$16 sps:$4 sm:$0xff]  }
  0x66   :  { %v3167_v23 = vld [vmem:[#allocation7 + $0xe0] ss:$16 sps:$4 sm:$0xff]   ;;  %v3154_v28 = vld [vmem:[#allocation7 + $0x8c] ss:$16 sps:$4 sm:$0xff]  }
  0x67   :  { %521 = vmatpush1.bf16.msra.mxu0 %v3049_v20  ;;  %v3142_v20 = vld [vmem:[#allocation7 + $0x4c] ss:$16 sps:$4 sm:$0xff]   ;;  %v3173_v27 = vld [vmem:[#allocation7 + $0x100] ss:$16 sps:$4 sm:$0xff]  }
  0x68   :  { %522 = vmatprep.subr.bf16.mxu0 %v3050_v22  ;;  %564 = vmatpush1.bf16.msra.mxu1 %v3100_v43  ;;  %v3140_v22 = vld [vmem:[#allocation7 + $0x48] ss:$16 sps:$4 sm:$0xff]   ;;  %v3179_v31 = vld [vmem:[#allocation7 + $0x120] ss:$16 sps:$4 sm:$0xff]   ;;  %v3160_v32 = vld [vmem:[#allocation7 + $0xac] ss:$16 sps:$4 sm:$0xff]  }
  0x69   :  { %565 = vmatprep.subr.bf16.mxu1 %v3101_v44  ;;  %v3185_v35 = vld [vmem:[#allocation7 + $0x140] ss:$16 sps:$4 sm:$0xff]   ;;  %v3166_v36 = vld [vmem:[#allocation7 + $0xcc] ss:$16 sps:$4 sm:$0xff]  }
  0x6a   :  { %v3191_v39 = vld [vmem:[#allocation7 + $0x160] ss:$16 sps:$4 sm:$0xff]   ;;  %v3172_v40 = vld [vmem:[#allocation7 + $0xec] ss:$16 sps:$4 sm:$0xff]  }
  0x6b   :  { %523 = vmatpush1.bf16.msra.mxu0 %v3052_v25  ;;  %v3175_v25 = vld [vmem:[#allocation7 + $0x104] ss:$16 sps:$4 sm:$0xff]   ;;  %v3197_v43 = vld [vmem:[#allocation7 + $0x180] ss:$16 sps:$4 sm:$0xff]   ;;  %v3178_v44 = vld [vmem:[#allocation7 + $0x10c] ss:$16 sps:$4 sm:$0xff]  }
  0x6c   :  { %524 = vmatprep.subr.bf16.mxu0 %v3053_v26  ;;  %566 = vmatpush1.bf16.msra.mxu1 %v3103_v47  ;;  %v3146_v26 = vld [vmem:[#allocation7 + $0x68] ss:$16 sps:$4 sm:$0xff]   ;;  %v3203_v47 = vld [vmem:[#allocation7 + $0x1a0] ss:$16 sps:$4 sm:$0xff]  }
  0x6d   :  { %567 = vmatprep.subr.bf16.mxu1 %v3104_v48  ;;  %v3184_v48 = vld [vmem:[#allocation7 + $0x12c] ss:$16 sps:$4 sm:$0xff]  }
  0x6f   :  { %525 = vmatpush1.bf16.msra.mxu0 %v3055_v29  ;;  %v3181_v29 = vld [vmem:[#allocation7 + $0x124] ss:$16 sps:$4 sm:$0xff]  }
  0x70   :  { %526 = vmatprep.subr.bf16.mxu0 %v3056_v30  ;;  %568 = vmatpush1.bf16.msra.mxu1 %v3106_v51  ;;  %v3152_v30 = vld [vmem:[#allocation7 + $0x88] ss:$16 sps:$4 sm:$0xff]  }
  0x71   :  { %569 = vmatprep.subr.bf16.mxu1 %v3107_v52  ;;  %v3188_v51 = vld [vmem:[#allocation7 + $0x148] ss:$16 sps:$4 sm:$0xff]   ;;  %v3196_v52 = vld [vmem:[#allocation7 + $0x16c] ss:$16 sps:$4 sm:$0xff]  }
  0x73   :  { %527 = vmatpush1.bf16.msra.mxu0 %v3058_v33  ;;  %v3187_v33 = vld [vmem:[#allocation7 + $0x144] ss:$16 sps:$4 sm:$0xff]  }
  0x74   :  { %528 = vmatprep.subr.bf16.mxu0 %v3059_v34  ;;  %570 = vmatpush1.bf16.msra.mxu1 %v3109_v54  ;;  %v3158_v34 = vld [vmem:[#allocation7 + $0xa8] ss:$16 sps:$4 sm:$0xff]   ;;  %v3202_v54 = vld [vmem:[#allocation7 + $0x18c] ss:$16 sps:$4 sm:$0xff]  }
  0x75   :  { %571 = vmatprep.subr.bf16.mxu1 %v3110_v55  ;;  %v3200_v55 = vld [vmem:[#allocation7 + $0x188] ss:$16 sps:$4 sm:$0xff]  }
  0x77   :  { %529 = vmatpush1.bf16.msra.mxu0 %v3061_v37  ;;  %v3193_v37 = vld [vmem:[#allocation7 + $0x164] ss:$16 sps:$4 sm:$0xff]  }
  0x78   :  { %530 = vmatprep.subr.bf16.mxu0 %v3062_v38  ;;  %572 = vmatpush1.bf16.msra.mxu1 %v3112_v58  ;;  %v3164_v38 = vld [vmem:[#allocation7 + $0xc8] ss:$16 sps:$4 sm:$0xff]   ;;  %v3211_v58 = vld [vmem:[#allocation7 + $0x1c4] ss:$16 sps:$4 sm:$0xff]  }
  0x79   :  { %573 = vmatprep.subr.bf16.mxu1 %v3113_v59  ;;  %v3214_v59 = vld [vmem:[#allocation7 + $0x1cc] ss:$16 sps:$4 sm:$0xff]  }
  0x7b   :  { %531 = vmatpush1.bf16.msra.mxu0 %v3064_v41  ;;  %v3199_v41 = vld [vmem:[#allocation7 + $0x184] ss:$16 sps:$4 sm:$0xff]  }
  0x7c   :  { %532 = vmatprep.subr.bf16.mxu0 %v3065_v42  ;;  %574 = vmatpush1.bf16.msra.mxu1 %v3115_v62  ;;  %v3170_v42 = vld [vmem:[#allocation7 + $0xe8] ss:$16 sps:$4 sm:$0xff]   ;;  %v3217_v62 = vld [vmem:[#allocation7 + $0x1e4] ss:$16 sps:$4 sm:$0xff]  }
  0x7d   :  { %575 = vmatprep.subr.bf16.mxu1 %v3116_v63  ;;  %v3220_v63 = vld [vmem:[#allocation7 + $0x1ec] ss:$16 sps:$4 sm:$0xff]  }
  0x7f   :  { %533 = vmatpush1.bf16.msra.mxu0 %v3067_v45  ;;  %v3205_v45 = vld [vmem:[#allocation7 + $0x1a4] ss:$16 sps:$4 sm:$0xff]  }
  0x80   :  { %534 = vmatprep.subr.bf16.mxu0 %v3068_v46  ;;  %576 = vmatpush1.bf16.msra.mxu1 %v3118_v2  ;;  %v3176_v46 = vld [vmem:[#allocation7 + $0x108] ss:$16 sps:$4 sm:$0xff]   ;;  %v3223_v2 = vld [vmem:[#allocation7 + $0x204] ss:$16 sps:$4 sm:$0xff]  }
  0x81   :  { %577 = vmatprep.subr.bf16.mxu1 %v3119_v3  ;;  %v3226_v3 = vld [vmem:[#allocation7 + $0x20c] ss:$16 sps:$4 sm:$0xff]  }
  0x83   :  { %535 = vmatpush1.bf16.msra.mxu0 %v3070_v49  ;;  %v3182_v49 = vld [vmem:[#allocation7 + $0x128] ss:$16 sps:$4 sm:$0xff]  }
  0x84   :  { %536 = vmatprep.subr.bf16.mxu0 %v3074_v50  ;;  %578 = vmatpush1.bf16.msra.mxu1 %v3121_v6  ;;  %v3190_v50 = vld [vmem:[#allocation7 + $0x14c] ss:$16 sps:$4 sm:$0xff]  }
  0x85   :  { %579 = vmatprep.subr.bf16.mxu1 %v3122_v7  ;;  %v154_v7 = vld [vmem:[%s3792_s2] sm:$0xf] }
  0x87   :  { %537 = vmatpush1.bf16.msra.mxu0 %v3076_v53  ;;  %v3194_v53 = vld [vmem:[#allocation7 + $0x168] ss:$16 sps:$4 sm:$0xff]  }
  0x88   :  { %1410 = vmatprep.subr.bf16.mxu0 %v3127_v56  ;;  %580 = vmatpush1.bf16.msra.mxu1 %v3124_v10  ;;  %v3208_v56 = vld [vmem:[#allocation7 + $0x1ac] ss:$16 sps:$4 sm:$0xff]  }
  0x89   :  { %1496 = vmatprep.subr.bf16.mxu1 %v3130_v11 }
  0x8a   :  { %539 = vmatmul.mubr.bf16.vlgmr.msra.gmra.mrb[0].mxu0 %v3079_v57 }
  0x8b   :  { %1411 = vmatpush1.bf16.msra.mxu0 %v3125_v60  ;;  %582 = vmatmul.mubr.bf16.vlgmr.msra.gmra.mrb[0].mxu1 %v3079_v57  ;;  %v3206_v57 = vld [vmem:[#allocation7 + $0x1a8] ss:$16 sps:$4 sm:$0xff]   ;;  %v3209_v60 = vld [vmem:[#allocation7 + $0x1c0] ss:$16 sps:$4 sm:$0xff]  }
  0x8c   :  { %1412 = vmatprep.subr.bf16.mxu0 %v3133_v61  ;;  %1497 = vmatpush1.bf16.msra.mxu1 %v3128_v14  ;;  %v3212_v61 = vld [vmem:[#allocation7 + $0x1c8] ss:$16 sps:$4 sm:$0xff]  }
  0x8d   :  { %1498 = vmatprep.subr.bf16.mxu1 %v3136_v16 }
  0x8f   :  { %1413 = vmatpush1.bf16.msra.mxu0 %v3131_v0  ;;  %v3215_v0 = vld [vmem:[#allocation7 + $0x1e0] ss:$16 sps:$4 sm:$0xff]  }
  0x90   :  { %1414 = vmatprep.subr.bf16.mxu0 %v3139_v1  ;;  %1499 = vmatpush1.bf16.msra.mxu1 %v3134_v18  ;;  %v3218_v1 = vld [vmem:[#allocation7 + $0x1e8] ss:$16 sps:$4 sm:$0xff]  }
  0x91   :  { %1500 = vmatprep.subr.bf16.mxu1 %v3142_v20 }
  0x93   :  { %1415 = vmatpush1.bf16.msra.mxu0 %v3137_v4  ;;  %v156_v4 = vlaneseq }
  0x94   :  { %1416 = vmatprep.subr.bf16.mxu0 %v3145_v5  ;;  %1501 = vmatpush1.bf16.msra.mxu1 %v3140_v22 }
  0x95   :  { %1502 = vmatprep.subr.bf16.mxu1 %v3148_v24  ;;  %v157_v5 = vshrl.u32 %v156_v4, 7 }
  0x97   :  { %1417 = vmatpush1.bf16.msra.mxu0 %v3143_v8  ;;  %v3733_v6 = vsub.s32 0, %v157_v5  ;;  %v3738_v8 = vsub.s32 1, %v157_v5 }
  0x98   :  { %1418 = vmatprep.subr.bf16.mxu0 %v3151_v9  ;;  %1503 = vmatpush1.bf16.msra.mxu1 %v3146_v26 }
  0x99   :  { %1504 = vmatprep.subr.bf16.mxu1 %v3154_v28  ;;  %v159_v9 = vrot.slane %v154_v7, %v3733_v6  ;;  %v163_v10 = vrot.slane %v154_v7, %v3738_v8 }
  0x9b   :  { %1419 = vmatpush1.bf16.msra.mxu0 %v3149_v12 }
  0x9c   :  { %1420 = vmatprep.subr.bf16.mxu0 %v3157_v13  ;;  %1505 = vmatpush1.bf16.msra.mxu1 %v3152_v30  ;;  %v3224_v30 = vld [vmem:[#allocation7 + $0x208] ss:$16 sps:$4 sm:$0xff]  }
  0x9d   :  { %1506 = vmatprep.subr.bf16.mxu1 %v3160_v32  ;;  %v3232_v32 = vld [vmem:[#allocation7 + $0x22c] ss:$16 sps:$4 sm:$0xff]  }
  0x9f   :  { %1421 = vmatpush1.bf16.msra.mxu0 %v3155_v15 }
  0xa0   :  { %1422 = vmatprep.subr.bf16.mxu0 %v3163_v17  ;;  %1507 = vmatpush1.bf16.msra.mxu1 %v3158_v34  ;;  %v3230_v34 = vld [vmem:[#allocation7 + $0x228] ss:$16 sps:$4 sm:$0xff]  }
  0xa1   :  { %1508 = vmatprep.subr.bf16.mxu1 %v3166_v36  ;;  %v3235_v36 = vld [vmem:[#allocation7 + $0x244] ss:$16 sps:$4 sm:$0xff]  }
  0xa3   :  { %1423 = vmatpush1.bf16.msra.mxu0 %v3161_v19 }
  0xa4   :  { %1424 = vmatprep.subr.bf16.mxu0 %v3169_v21  ;;  %1509 = vmatpush1.bf16.msra.mxu1 %v3164_v38  ;;  %v3744_v38 = vsub.s32 3, %v157_v5 }
  0xa5   :  { %1510 = vmatprep.subr.bf16.mxu1 %v3172_v40  ;;  %v3236_v40 = vld [vmem:[#allocation7 + $0x248] ss:$16 sps:$4 sm:$0xff]  }
  0xa7   :  { %1425 = vmatpush1.bf16.msra.mxu0 %v3167_v23 }
  0xa8   :  { %1426 = vmatprep.subr.bf16.mxu0 %v3175_v25  ;;  %1511 = vmatpush1.bf16.msra.mxu1 %v3170_v42  ;;  %v3241_v42 = vld [vmem:[#allocation7 + $0x264] ss:$16 sps:$4 sm:$0xff]  }
  0xa9   :  { %1512 = vmatprep.subr.bf16.mxu1 %v3178_v44  ;;  %v171_v44 = vrot.slane %v154_v7, %v3744_v38 }
  0xab   :  { %1427 = vmatpush1.bf16.msra.mxu0 %v3173_v27 }
  0xac   :  { %1428 = vmatprep.subr.bf16.mxu0 %v3181_v29  ;;  %1513 = vmatpush1.bf16.msra.mxu1 %v3176_v46  ;;  %v3221_v29 = vld [vmem:[#allocation7 + $0x200] ss:$16 sps:$4 sm:$0xff]  }
  0xad   :  { %1514 = vmatprep.subr.bf16.mxu1 %v3184_v48  ;;  %v3239_v46 = vld [vmem:[#allocation7 + $0x260] ss:$16 sps:$4 sm:$0xff]  }
  0xaf   :  { %1429 = vmatpush1.bf16.msra.mxu0 %v3179_v31  ;;  %v3229_v31 = vld [vmem:[#allocation7 + $0x224] ss:$16 sps:$4 sm:$0xff]  }
  0xb0   :  { %1430 = vmatprep.subr.bf16.mxu0 %v3187_v33  ;;  %1515 = vmatpush1.bf16.msra.mxu1 %v3182_v49  ;;  %v3227_v33 = vld [vmem:[#allocation7 + $0x220] ss:$16 sps:$4 sm:$0xff]  }
  0xb1   :  { %1516 = vmatprep.subr.bf16.mxu1 %v3190_v50  ;;  %v3247_v50 = vld [vmem:[#allocation7 + $0x284] ss:$16 sps:$4 sm:$0xff]  }
  0xb3   :  { %1431 = vmatpush1.bf16.msra.mxu0 %v3185_v35  ;;  %v3742_v35 = vsub.s32 2, %v157_v5 }
  0xb4   :  { %1432 = vmatprep.subr.bf16.mxu0 %v3193_v37  ;;  %1517 = vmatpush1.bf16.msra.mxu1 %v3188_v51  ;;  %v3238_v37 = vld [vmem:[#allocation7 + $0x24c] ss:$16 sps:$4 sm:$0xff]  }
  0xb5   :  { %1518 = vmatprep.subr.bf16.mxu1 %v3196_v52  ;;  %v3250_v51 = vld [vmem:[#allocation7 + $0x28c] ss:$16 sps:$4 sm:$0xff]  }
  0xb7   :  { %1433 = vmatpush1.bf16.msra.mxu0 %v3191_v39  ;;  %v3233_v39 = vld [vmem:[#allocation7 + $0x240] ss:$16 sps:$4 sm:$0xff]  }
  0xb8   :  { %1434 = vmatprep.subr.bf16.mxu0 %v3199_v41  ;;  %1519 = vmatpush1.bf16.msra.mxu1 %v3194_v53  ;;  %v167_v41 = vrot.slane %v154_v7, %v3742_v35  ;;  %v3251_v7 = vld [vmem:[#allocation7 + $0x2a0] ss:$16 sps:$4 sm:$0xff]  }
  0xb9   :  { %1520 = vmatprep.subr.bf16.mxu1 %v3202_v54  ;;  %v3245_v54 = vld [vmem:[#allocation7 + $0x280] ss:$16 sps:$4 sm:$0xff]  }
  0xbb   :  { %1435 = vmatpush1.bf16.msra.mxu0 %v3197_v43  ;;  %v3244_v43 = vld [vmem:[#allocation7 + $0x26c] ss:$16 sps:$4 sm:$0xff]  }
  0xbc   :  { %1436 = vmatprep.subr.bf16.mxu0 %v3205_v45  ;;  %1521 = vmatpush1.bf16.msra.mxu1 %v3200_v55 }
  0xbd   :  { %1522 = vmatprep.subr.bf16.mxu1 %v3208_v56 }
  0xbf   :  { %1437 = vmatpush1.bf16.msra.mxu0 %v3203_v47  ;;  %v3242_v47 = vld [vmem:[#allocation7 + $0x268] ss:$16 sps:$4 sm:$0xff]  }
  0xc0   :  { %1523 = vmatpush1.bf16.msra.mxu1 %v3206_v57  ;;  %1438 = vmatprep.subr.bf16.mxu0 %v3211_v58  ;;  %v3248_v58 = vld [vmem:[#allocation7 + $0x288] ss:$16 sps:$4 sm:$0xff]  }
  0xc1   :  { %1524 = vmatprep.subr.bf16.mxu1 %v3214_v59 }
  0xc3   :  { %1439 = vmatpush1.bf16.msra.mxu0 %v3209_v60 }
  0xc4   :  { %1525 = vmatpush1.bf16.msra.mxu1 %v3212_v61  ;;  %1440 = vmatprep.subr.bf16.mxu0 %v3217_v62  ;;  %v3253_v61 = vld [vmem:[#allocation7 + $0x2a4] ss:$16 sps:$4 sm:$0xff]  }
  0xc5   :  { %1526 = vmatprep.subr.bf16.mxu1 %v3220_v63 }
  0xc7   :  { %1441 = vmatpush1.bf16.msra.mxu0 %v3215_v0  ;;  %v3256_v0 = vld [vmem:[#allocation7 + $0x2ac] ss:$16 sps:$4 sm:$0xff]  }
  0xc8   :  { %1527 = vmatpush1.bf16.msra.mxu1 %v3218_v1  ;;  %1453 = vmatprep.subr.bf16.mxu0 %v3223_v2 }
  0xc9   :  { %1539 = vmatprep.subr.bf16.mxu1 %v3226_v3 }
 0x15d   :  { %v540_v11 = vpop.f32.mrb[0].mxu0 }
 0x15e   :  { %v541_v12 = vadd.f32 %v540_v11, %v159_v9  ;;  %v542_v13 = vpop.f32.mrb[1].mxu0  ;;  %v583_v45 = vpop.f32.mrb[0].mxu1  ;;  %v3259_v11 = vld [vmem:[#allocation7 + $0x2c4] ss:$16 sps:$4 sm:$0xff]  }
 0x15f   :  { %v543_v14 = vadd.f32 %v542_v13, %v163_v10  ;;  %v544_v15 = vpop.f32.mrb[2].mxu0  ;;  %v584_v48 = vadd.f32 %v583_v45, %v167_v41  ;;  %v585_v49 = vpop.f32.mrb[1].mxu1  ;;  %v3257_v13 = vld [vmem:[#allocation7 + $0x2c0] ss:$16 sps:$4 sm:$0xff]   ;;  %v3307_v45 = vld [vmem:[#allocation7 + $0x3c4] ss:$16 sps:$4 sm:$0xff]  }
 0x160   :  { %v600_v16 = vmul.f32 0.2, %v541_v12  ;;  %v545_v17 = vadd.f32 %v544_v15, %v159_v9  ;;  %v546_v18 = vpop.f32.mrb[3].mxu0  ;;  %vm592_vm0 = vcmp.gt.f32.partialorder %v541_v12, 0.0  ;;  %v586_v52 = vadd.f32 %v585_v49, %v171_v44  ;;  %v587_v53 = vpop.f32.mrb[2].mxu1 }
 0x161   :  { %v601_v19 = vmul.f32 0.2, %v543_v14  ;;  %v547_v20 = vadd.f32 %v546_v18, %v163_v10  ;;  %vm593_vm1 = vcmp.gt.f32.partialorder %v543_v14, 0.0  ;;  %vm594_vm4 = vcmp.gt.f32.partialorder %v584_v48, 0.0  ;;  %v589_v57 = vpop.f32.mrb[3].mxu1 }
 0x162   :  { %vm596_vm2 = vcmp.gt.f32.partialorder %v545_v17, 0.0  ;;  %v604_v21 = vmul.f32 0.2, %v545_v17  ;;  %v608_v23 = vsel %vm592_vm0, %v541_v12, %v600_v16  ;;  %v602_v55 = vmul.f32 0.2, %v584_v48 }
 0x163   :  { %vm597_vm3 = vcmp.gt.f32.partialorder %v547_v20, 0.0  ;;  %v605_v22 = vmul.f32 0.2, %v547_v20  ;;  %v609_v26 = vsel %vm593_vm1, %v543_v14, %v601_v19  ;;  %v588_v56 = vadd.f32 %v587_v53, %v167_v41  ;;  %v3254_v9 = vld [vmem:[#allocation7 + $0x2a8] ss:$16 sps:$4 sm:$0xff]  }
 0x164   :  { %v612_v24 = vsel %vm596_vm2, %v545_v17, %v604_v21  ;;  %vm595_vm5 = vcmp.gt.f32.partialorder %v586_v52, 0.0  ;;  %v603_v59 = vmul.f32 0.2, %v586_v52  ;;  %v590_v60 = vadd.f32 %v589_v57, %v171_v44  ;;  %v3262_v12 = vld [vmem:[#allocation7 + $0x2cc] ss:$16 sps:$4 sm:$0xff]  }
 0x165   :  { %v616_v25 = vpack.c.bf16 %v612_v24, %v608_v23  ;;  %v613_v27 = vsel %vm597_vm3, %v547_v20, %v605_v22  ;;  %v610_v62 = vsel %vm594_vm4, %v584_v48, %v602_v55  ;;  %vm598_vm6 = vcmp.gt.f32.partialorder %v588_v56, 0.0  ;;  %v3260_v14 = vld [vmem:[#allocation7 + $0x2c8] ss:$16 sps:$4 sm:$0xff]   ;;  %v3265_v15 = vld [vmem:[#allocation7 + $0x2e4] ss:$16 sps:$4 sm:$0xff]  }
 0x166   :  { %v617_v28 = vpack.c.bf16 %v613_v27, %v609_v26  ;;  %v606_v63 = vmul.f32 0.2, %v588_v56  ;;  %vm599_vm7 = vcmp.gt.f32.partialorder %v590_v60, 0.0  ;;  %v607_v1 = vmul.f32 0.2, %v590_v60 }
 0x167   :  { %v611_v2 = vsel %vm595_vm5, %v586_v52, %v603_v59  ;;  %v3268_v16 = vld [vmem:[#allocation7 + $0x2ec] ss:$16 sps:$4 sm:$0xff]   ;;  %v3263_v17 = vld [vmem:[#allocation7 + $0x2e0] ss:$16 sps:$4 sm:$0xff]   ;;  %v3266_v18 = vld [vmem:[#allocation7 + $0x2e8] ss:$16 sps:$4 sm:$0xff]  }
 0x168   :  { %1442 = vmatprep.mubr.bf16.mxu0 %v617_v28  ;;  %1528 = vmatprep.mubr.bf16.mxu1 %v617_v28  ;;  %v614_v3 = vsel %vm598_vm6, %v588_v56, %v606_v63  ;;  %v615_v5 = vsel %vm599_vm7, %v590_v60, %v607_v1  ;;  %v3271_v19 = vld [vmem:[#allocation7 + $0x304] ss:$16 sps:$4 sm:$0xff]   ;;  %v3274_v20 = vld [vmem:[#allocation7 + $0x30c] ss:$16 sps:$4 sm:$0xff]   ;;  %v3269_v21 = vld [vmem:[#allocation7 + $0x300] ss:$16 sps:$4 sm:$0xff]  }
 0x169   :  { %1443 = vmatmul.mubr.bf16.vlgmr.msra.gmra.mrb[4].mxu0 %v616_v25  ;;  %1529 = vmatmul.mubr.bf16.vlgmr.msra.gmra.mrb[4].mxu1 %v616_v25  ;;  %v3748_v4 = vpack.c.bf16 %v614_v3, %v610_v62  ;;  %v619_v10 = vpack.c.bf16 %v615_v5, %v611_v2  ;;  %v3272_v22 = vld [vmem:[#allocation7 + $0x308] ss:$16 sps:$4 sm:$0xff]   ;;  %v3277_v23 = vld [vmem:[#allocation7 + $0x324] ss:$16 sps:$4 sm:$0xff]   ;;  %v3280_v24 = vld [vmem:[#allocation7 + $0x32c] ss:$16 sps:$4 sm:$0xff]  }
 0x16a   :  { %1454 = vmatpush1.bf16.msra.mxu0 %v3221_v29  ;;  %1540 = vmatpush1.bf16.msra.mxu1 %v3224_v30  ;;  %v3275_v25 = vld [vmem:[#allocation7 + $0x320] ss:$16 sps:$4 sm:$0xff]   ;;  %v3278_v26 = vld [vmem:[#allocation7 + $0x328] ss:$16 sps:$4 sm:$0xff]   ;;  %v3283_v27 = vld [vmem:[#allocation7 + $0x344] ss:$16 sps:$4 sm:$0xff]  }
 0x16b   :  { %1455 = vmatprep.subr.bf16.mxu0 %v3229_v31  ;;  %1541 = vmatprep.subr.bf16.mxu1 %v3232_v32  ;;  %v3286_v28 = vld [vmem:[#allocation7 + $0x34c] ss:$16 sps:$4 sm:$0xff]   ;;  %v3281_v29 = vld [vmem:[#allocation7 + $0x340] ss:$16 sps:$4 sm:$0xff]   ;;  %v3284_v30 = vld [vmem:[#allocation7 + $0x348] ss:$16 sps:$4 sm:$0xff]  }
 0x16c   :  { %1485 = vmatprep.mubr.bf16.mxu0 %v619_v10  ;;  %1571 = vmatprep.mubr.bf16.mxu1 %v619_v10  ;;  %v3289_v31 = vld [vmem:[#allocation7 + $0x364] ss:$16 sps:$4 sm:$0xff]   ;;  %v3292_v32 = vld [vmem:[#allocation7 + $0x36c] ss:$16 sps:$4 sm:$0xff]   ;;  %v3302_v44 = vld [vmem:[#allocation7 + $0x3a8] ss:$16 sps:$4 sm:$0xff]  }
 0x16d   :  { %v3301_v41 = vld [vmem:[#allocation7 + $0x3a4] ss:$16 sps:$4 sm:$0xff]   ;;  %v3308_v48 = vld [vmem:[#allocation7 + $0x3c8] ss:$16 sps:$4 sm:$0xff]   ;;  %v3317_v55 = vld [vmem:[#allocation8] ss:$16 sps:$4 sm:$0xff]  }
 0x16e   :  { %1456 = vmatpush1.bf16.msra.mxu0 %v3227_v33  ;;  %1542 = vmatpush1.bf16.msra.mxu1 %v3230_v34  ;;  %v3287_v33 = vld [vmem:[#allocation7 + $0x360] ss:$16 sps:$4 sm:$0xff]   ;;  %v3290_v34 = vld [vmem:[#allocation7 + $0x368] ss:$16 sps:$4 sm:$0xff]   ;;  %v3313_v49 = vld [vmem:[#allocation7 + $0x3e4] ss:$16 sps:$4 sm:$0xff]  }
 0x16f   :  { %1457 = vmatprep.subr.bf16.mxu0 %v3235_v36  ;;  %1543 = vmatprep.subr.bf16.mxu1 %v3238_v37  ;;  %v3295_v36 = vld [vmem:[#allocation7 + $0x384] ss:$16 sps:$4 sm:$0xff]   ;;  %v3298_v37 = vld [vmem:[#allocation7 + $0x38c] ss:$16 sps:$4 sm:$0xff]   ;;  %v3314_v52 = vld [vmem:[#allocation7 + $0x3e8] ss:$16 sps:$4 sm:$0xff]  }
 0x170   :  { %v3319_v53 = vld [vmem:[#allocation8 + $0x4] ss:$16 sps:$4 sm:$0xff]   ;;  %v3320_v56 = vld [vmem:[#allocation8 + $0x8] ss:$16 sps:$4 sm:$0xff]   ;;  %v3323_v59 = vld [vmem:[#allocation8 + $0x20] ss:$16 sps:$4 sm:$0xff]  }
 0x171   :  { %v3325_v57 = vld [vmem:[#allocation8 + $0x24] ss:$16 sps:$4 sm:$0xff]   ;;  %v3326_v60 = vld [vmem:[#allocation8 + $0x28] ss:$16 sps:$4 sm:$0xff]   ;;  %v3334_v62 = vld [vmem:[#allocation8 + $0x4c] ss:$16 sps:$4 sm:$0xff]  }
 0x172   :  { %1458 = vmatpush1.bf16.msra.mxu0 %v3233_v39  ;;  %1544 = vmatpush1.bf16.msra.mxu1 %v3236_v40  ;;  %v3293_v39 = vld [vmem:[#allocation7 + $0x380] ss:$16 sps:$4 sm:$0xff]   ;;  %v3296_v40 = vld [vmem:[#allocation7 + $0x388] ss:$16 sps:$4 sm:$0xff]   ;;  %v3337_v1 = vld [vmem:[#allocation8 + $0x64] ss:$16 sps:$4 sm:$0xff]  }
 0x173   :  { %1459 = vmatprep.subr.bf16.mxu0 %v3241_v42  ;;  %1545 = vmatprep.subr.bf16.mxu1 %v3244_v43  ;;  %v3304_v42 = vld [vmem:[#allocation7 + $0x3ac] ss:$16 sps:$4 sm:$0xff]   ;;  %v3299_v43 = vld [vmem:[#allocation7 + $0x3a0] ss:$16 sps:$4 sm:$0xff]   ;;  %v3343_v5 = vld [vmem:[#allocation8 + $0x84] ss:$16 sps:$4 sm:$0xff]  }
 0x174   :  { %v3329_v63 = vld [vmem:[#allocation8 + $0x40] ss:$16 sps:$4 sm:$0xff]   ;;  %v3340_v2 = vld [vmem:[#allocation8 + $0x6c] ss:$16 sps:$4 sm:$0xff]   ;;  %v3344_v10 = vld [vmem:[#allocation8 + $0x88] ss:$16 sps:$4 sm:$0xff]  }
 0x175   :  { %v3335_v3 = vld [vmem:[#allocation8 + $0x60] ss:$16 sps:$4 sm:$0xff]  }
 0x176   :  { %1460 = vmatpush1.bf16.msra.mxu0 %v3239_v46  ;;  %1546 = vmatpush1.bf16.msra.mxu1 %v3242_v47  ;;  %v3310_v46 = vld [vmem:[#allocation7 + $0x3cc] ss:$16 sps:$4 sm:$0xff]   ;;  %v3305_v47 = vld [vmem:[#allocation7 + $0x3c0] ss:$16 sps:$4 sm:$0xff]  }
 0x177   :  { %1461 = vmatprep.subr.bf16.mxu0 %v3247_v50  ;;  %1547 = vmatprep.subr.bf16.mxu1 %v3250_v51  ;;  %v3316_v50 = vld [vmem:[#allocation7 + $0x3ec] ss:$16 sps:$4 sm:$0xff]   ;;  %v3311_v51 = vld [vmem:[#allocation7 + $0x3e0] ss:$16 sps:$4 sm:$0xff]  }
 0x17a   :  { %1462 = vmatpush1.bf16.msra.mxu0 %v3245_v54  ;;  %1548 = vmatpush1.bf16.msra.mxu1 %v3248_v58  ;;  %v3322_v54 = vld [vmem:[#allocation8 + $0xc] ss:$16 sps:$4 sm:$0xff]  }
 0x17b   :  { %1463 = vmatprep.subr.bf16.mxu0 %v3253_v61  ;;  %1549 = vmatprep.subr.bf16.mxu1 %v3256_v0  ;;  %v3328_v58 = vld [vmem:[#allocation8 + $0x2c] ss:$16 sps:$4 sm:$0xff]   ;;  %v3331_v61 = vld [vmem:[#allocation8 + $0x44] ss:$16 sps:$4 sm:$0xff]   ;;  %v3332_v0 = vld [vmem:[#allocation8 + $0x48] ss:$16 sps:$4 sm:$0xff]  }
 0x17e   :  { %1464 = vmatpush1.bf16.msra.mxu0 %v3251_v7  ;;  %1550 = vmatpush1.bf16.msra.mxu1 %v3254_v9  ;;  %v3346_v7 = vld [vmem:[#allocation8 + $0x8c] ss:$16 sps:$4 sm:$0xff]   ;;  %v3341_v9 = vld [vmem:[#allocation8 + $0x80] ss:$16 sps:$4 sm:$0xff]  }
 0x17f   :  { %1465 = vmatprep.subr.bf16.mxu0 %v3259_v11  ;;  %1551 = vmatprep.subr.bf16.mxu1 %v3262_v12  ;;  %v3349_v11 = vld [vmem:[#allocation8 + $0xa4] ss:$16 sps:$4 sm:$0xff]   ;;  %v3352_v12 = vld [vmem:[#allocation8 + $0xac] ss:$16 sps:$4 sm:$0xff]  }
 0x182   :  { %1466 = vmatpush1.bf16.msra.mxu0 %v3257_v13  ;;  %1552 = vmatpush1.bf16.msra.mxu1 %v3260_v14  ;;  %v3347_v13 = vld [vmem:[#allocation8 + $0xa0] ss:$16 sps:$4 sm:$0xff]   ;;  %v3350_v14 = vld [vmem:[#allocation8 + $0xa8] ss:$16 sps:$4 sm:$0xff]  }
 0x183   :  { %1467 = vmatprep.subr.bf16.mxu0 %v3265_v15  ;;  %1553 = vmatprep.subr.bf16.mxu1 %v3268_v16  ;;  %v3355_v15 = vld [vmem:[#allocation8 + $0xc4] ss:$16 sps:$4 sm:$0xff]   ;;  %v3358_v16 = vld [vmem:[#allocation8 + $0xcc] ss:$16 sps:$4 sm:$0xff]  }
 0x186   :  { %1468 = vmatpush1.bf16.msra.mxu0 %v3263_v17  ;;  %1554 = vmatpush1.bf16.msra.mxu1 %v3266_v18  ;;  %v3353_v17 = vld [vmem:[#allocation8 + $0xc0] ss:$16 sps:$4 sm:$0xff]   ;;  %v3356_v18 = vld [vmem:[#allocation8 + $0xc8] ss:$16 sps:$4 sm:$0xff]  }
 0x187   :  { %1469 = vmatprep.subr.bf16.mxu0 %v3271_v19  ;;  %1555 = vmatprep.subr.bf16.mxu1 %v3274_v20  ;;  %v3361_v19 = vld [vmem:[#allocation8 + $0xe4] ss:$16 sps:$4 sm:$0xff]   ;;  %v3364_v20 = vld [vmem:[#allocation8 + $0xec] ss:$16 sps:$4 sm:$0xff]  }
 0x18a   :  { %1470 = vmatpush1.bf16.msra.mxu0 %v3269_v21  ;;  %1556 = vmatpush1.bf16.msra.mxu1 %v3272_v22  ;;  %v3359_v21 = vld [vmem:[#allocation8 + $0xe0] ss:$16 sps:$4 sm:$0xff]   ;;  %v3362_v22 = vld [vmem:[#allocation8 + $0xe8] ss:$16 sps:$4 sm:$0xff]  }
 0x18b   :  { %1471 = vmatprep.subr.bf16.mxu0 %v3277_v23  ;;  %1557 = vmatprep.subr.bf16.mxu1 %v3280_v24  ;;  %v3367_v23 = vld [vmem:[#allocation8 + $0x104] ss:$16 sps:$4 sm:$0xff]   ;;  %v3370_v24 = vld [vmem:[#allocation8 + $0x10c] ss:$16 sps:$4 sm:$0xff]  }
 0x18e   :  { %1472 = vmatpush1.bf16.msra.mxu0 %v3275_v25  ;;  %1558 = vmatpush1.bf16.msra.mxu1 %v3278_v26  ;;  %v3365_v25 = vld [vmem:[#allocation8 + $0x100] ss:$16 sps:$4 sm:$0xff]   ;;  %v3368_v26 = vld [vmem:[#allocation8 + $0x108] ss:$16 sps:$4 sm:$0xff]  }
 0x18f   :  { %1473 = vmatprep.subr.bf16.mxu0 %v3283_v27  ;;  %1559 = vmatprep.subr.bf16.mxu1 %v3286_v28  ;;  %v3373_v27 = vld [vmem:[#allocation8 + $0x124] ss:$16 sps:$4 sm:$0xff]   ;;  %v3376_v28 = vld [vmem:[#allocation8 + $0x12c] ss:$16 sps:$4 sm:$0xff]  }
 0x192   :  { %1474 = vmatpush1.bf16.msra.mxu0 %v3281_v29  ;;  %1560 = vmatpush1.bf16.msra.mxu1 %v3284_v30  ;;  %v3371_v29 = vld [vmem:[#allocation8 + $0x120] ss:$16 sps:$4 sm:$0xff]   ;;  %v3374_v30 = vld [vmem:[#allocation8 + $0x128] ss:$16 sps:$4 sm:$0xff]  }
 0x193   :  { %1475 = vmatprep.subr.bf16.mxu0 %v3289_v31  ;;  %1561 = vmatprep.subr.bf16.mxu1 %v3292_v32  ;;  %v3379_v31 = vld [vmem:[#allocation8 + $0x144] ss:$16 sps:$4 sm:$0xff]   ;;  %v3382_v32 = vld [vmem:[#allocation8 + $0x14c] ss:$16 sps:$4 sm:$0xff]  }
 0x196   :  { %1476 = vmatpush1.bf16.msra.mxu0 %v3287_v33  ;;  %1562 = vmatpush1.bf16.msra.mxu1 %v3290_v34  ;;  %v3377_v33 = vld [vmem:[#allocation8 + $0x140] ss:$16 sps:$4 sm:$0xff]   ;;  %v3380_v34 = vld [vmem:[#allocation8 + $0x148] ss:$16 sps:$4 sm:$0xff]  }
 0x197   :  { %1477 = vmatprep.subr.bf16.mxu0 %v3295_v36  ;;  %1563 = vmatprep.subr.bf16.mxu1 %v3298_v37  ;;  %v3385_v36 = vld [vmem:[#allocation8 + $0x164] ss:$16 sps:$4 sm:$0xff]   ;;  %v3388_v37 = vld [vmem:[#allocation8 + $0x16c] ss:$16 sps:$4 sm:$0xff]  }
 0x19a   :  { %1478 = vmatpush1.bf16.msra.mxu0 %v3293_v39  ;;  %1564 = vmatpush1.bf16.msra.mxu1 %v3296_v40  ;;  %v3383_v39 = vld [vmem:[#allocation8 + $0x160] ss:$16 sps:$4 sm:$0xff]   ;;  %v3386_v40 = vld [vmem:[#allocation8 + $0x168] ss:$16 sps:$4 sm:$0xff]  }
 0x19b   :  { %1479 = vmatprep.subr.bf16.mxu0 %v3301_v41  ;;  %1565 = vmatprep.subr.bf16.mxu1 %v3304_v42  ;;  %v3391_v41 = vld [vmem:[#allocation8 + $0x184] ss:$16 sps:$4 sm:$0xff]   ;;  %v3394_v42 = vld [vmem:[#allocation8 + $0x18c] ss:$16 sps:$4 sm:$0xff]  }
 0x19e   :  { %1480 = vmatpush1.bf16.msra.mxu0 %v3299_v43  ;;  %1566 = vmatpush1.bf16.msra.mxu1 %v3302_v44  ;;  %v3389_v43 = vld [vmem:[#allocation8 + $0x180] ss:$16 sps:$4 sm:$0xff]   ;;  %v3392_v44 = vld [vmem:[#allocation8 + $0x188] ss:$16 sps:$4 sm:$0xff]  }
 0x19f   :  { %1481 = vmatprep.subr.bf16.mxu0 %v3307_v45  ;;  %1567 = vmatprep.subr.bf16.mxu1 %v3310_v46  ;;  %v3397_v45 = vld [vmem:[#allocation8 + $0x1a4] ss:$16 sps:$4 sm:$0xff]   ;;  %v3400_v46 = vld [vmem:[#allocation8 + $0x1ac] ss:$16 sps:$4 sm:$0xff]  }
 0x1a2   :  { %1482 = vmatpush1.bf16.msra.mxu0 %v3305_v47  ;;  %1568 = vmatpush1.bf16.msra.mxu1 %v3308_v48  ;;  %v3395_v47 = vld [vmem:[#allocation8 + $0x1a0] ss:$16 sps:$4 sm:$0xff]   ;;  %v3398_v48 = vld [vmem:[#allocation8 + $0x1a8] ss:$16 sps:$4 sm:$0xff]  }
 0x1a3   :  { %1483 = vmatprep.subr.bf16.mxu0 %v3313_v49  ;;  %1569 = vmatprep.subr.bf16.mxu1 %v3316_v50  ;;  %v3403_v49 = vld [vmem:[#allocation8 + $0x1c4] ss:$16 sps:$4 sm:$0xff]   ;;  %v3406_v50 = vld [vmem:[#allocation8 + $0x1cc] ss:$16 sps:$4 sm:$0xff]  }
 0x1a6   :  { %1484 = vmatpush1.bf16.msra.mxu0 %v3311_v51  ;;  %1570 = vmatpush1.bf16.msra.mxu1 %v3314_v52  ;;  %v3401_v51 = vld [vmem:[#allocation8 + $0x1c0] ss:$16 sps:$4 sm:$0xff]   ;;  %v3404_v52 = vld [vmem:[#allocation8 + $0x1c8] ss:$16 sps:$4 sm:$0xff]  }
 0x1a7   :  { %2400 = vmatprep.subr.bf16.mxu0 %v3319_v53  ;;  %2486 = vmatprep.subr.bf16.mxu1 %v3322_v54  ;;  %v3409_v53 = vld [vmem:[#allocation8 + $0x1e4] ss:$16 sps:$4 sm:$0xff]   ;;  %v3412_v54 = vld [vmem:[#allocation8 + $0x1ec] ss:$16 sps:$4 sm:$0xff]  }
 0x1a9   :  { %1486 = vmatmul.mubr.bf16.vlgmr.msra.gmra.mrb[4].mxu0 %v3748_v4  ;;  %1572 = vmatmul.mubr.bf16.vlgmr.msra.gmra.mrb[4].mxu1 %v3748_v4  ;;  %v3338_v4 = vld [vmem:[#allocation8 + $0x68] ss:$16 sps:$4 sm:$0xff]  }
 0x1aa   :  { %2401 = vmatpush1.bf16.msra.mxu0 %v3317_v55  ;;  %2487 = vmatpush1.bf16.msra.mxu1 %v3320_v56  ;;  %v3407_v55 = vld [vmem:[#allocation8 + $0x1e0] ss:$16 sps:$4 sm:$0xff]   ;;  %v3410_v56 = vld [vmem:[#allocation8 + $0x1e8] ss:$16 sps:$4 sm:$0xff]  }
 0x1ab   :  { %2402 = vmatprep.subr.bf16.mxu0 %v3325_v57  ;;  %2488 = vmatprep.subr.bf16.mxu1 %v3328_v58  ;;  %v3415_v57 = vld [vmem:[#allocation8 + $0x204] ss:$16 sps:$4 sm:$0xff]   ;;  %v3418_v58 = vld [vmem:[#allocation8 + $0x20c] ss:$16 sps:$4 sm:$0xff]  }
 0x1ae   :  { %2403 = vmatpush1.bf16.msra.mxu0 %v3323_v59  ;;  %2489 = vmatpush1.bf16.msra.mxu1 %v3326_v60  ;;  %v748_v59 = vld [vmem:[%s3794_s4] sm:$0xf] }
 0x1af   :  { %2404 = vmatprep.subr.bf16.mxu0 %v3331_v61  ;;  %2490 = vmatprep.subr.bf16.mxu1 %v3334_v62  ;;  %v753_v60 = vrot.slane %v748_v59, %v3733_v6  ;;  %v761_v61 = vrot.slane %v748_v59, %v3742_v35  ;;  %v757_v62 = vrot.slane %v748_v59, %v3738_v8 }
 0x1b2   :  { %2405 = vmatpush1.bf16.msra.mxu0 %v3329_v63  ;;  %2491 = vmatpush1.bf16.msra.mxu1 %v3332_v0  ;;  %v765_v63 = vrot.slane %v748_v59, %v3744_v38  ;;  %v3448_v59 = vld [vmem:[#allocation8 + $0x2ac] ss:$16 sps:$4 sm:$0xff]  }
 0x1b3   :  { %2406 = vmatprep.subr.bf16.mxu0 %v3337_v1  ;;  %2492 = vmatprep.subr.bf16.mxu1 %v3340_v2 }
 0x1b6   :  { %2407 = vmatpush1.bf16.msra.mxu0 %v3335_v3  ;;  %2493 = vmatpush1.bf16.msra.mxu1 %v3338_v4 }
 0x1b7   :  { %2408 = vmatprep.subr.bf16.mxu0 %v3343_v5  ;;  %2494 = vmatprep.subr.bf16.mxu1 %v3346_v7 }
 0x1ba   :  { %2409 = vmatpush1.bf16.msra.mxu0 %v3341_v9  ;;  %2495 = vmatpush1.bf16.msra.mxu1 %v3344_v10 }
 0x1bb   :  { %2410 = vmatprep.subr.bf16.mxu0 %v3349_v11  ;;  %2496 = vmatprep.subr.bf16.mxu1 %v3352_v12 }
 0x1be   :  { %2411 = vmatpush1.bf16.msra.mxu0 %v3347_v13  ;;  %2497 = vmatpush1.bf16.msra.mxu1 %v3350_v14 }
 0x1bf   :  { %2412 = vmatprep.subr.bf16.mxu0 %v3355_v15  ;;  %2498 = vmatprep.subr.bf16.mxu1 %v3358_v16 }
 0x1c2   :  { %2413 = vmatpush1.bf16.msra.mxu0 %v3353_v17  ;;  %2499 = vmatpush1.bf16.msra.mxu1 %v3356_v18 }
 0x1c3   :  { %2414 = vmatprep.subr.bf16.mxu0 %v3361_v19  ;;  %2500 = vmatprep.subr.bf16.mxu1 %v3364_v20 }
 0x1c6   :  { %2415 = vmatpush1.bf16.msra.mxu0 %v3359_v21  ;;  %2501 = vmatpush1.bf16.msra.mxu1 %v3362_v22 }
 0x1c7   :  { %2416 = vmatprep.subr.bf16.mxu0 %v3367_v23  ;;  %2502 = vmatprep.subr.bf16.mxu1 %v3370_v24 }
 0x1ca   :  { %2417 = vmatpush1.bf16.msra.mxu0 %v3365_v25  ;;  %2503 = vmatpush1.bf16.msra.mxu1 %v3368_v26 }
 0x1cb   :  { %2418 = vmatprep.subr.bf16.mxu0 %v3373_v27  ;;  %2504 = vmatprep.subr.bf16.mxu1 %v3376_v28 }
 0x1ce   :  { %2419 = vmatpush1.bf16.msra.mxu0 %v3371_v29  ;;  %2505 = vmatpush1.bf16.msra.mxu1 %v3374_v30 }
 0x1cf   :  { %2420 = vmatprep.subr.bf16.mxu0 %v3379_v31  ;;  %2506 = vmatprep.subr.bf16.mxu1 %v3382_v32 }
 0x1d2   :  { %2421 = vmatpush1.bf16.msra.mxu0 %v3377_v33  ;;  %2507 = vmatpush1.bf16.msra.mxu1 %v3380_v34 }
 0x1d3   :  { %2422 = vmatprep.subr.bf16.mxu0 %v3385_v36  ;;  %2508 = vmatprep.subr.bf16.mxu1 %v3388_v37 }
 0x1d6   :  { %2423 = vmatpush1.bf16.msra.mxu0 %v3383_v39  ;;  %2509 = vmatpush1.bf16.msra.mxu1 %v3386_v40  ;;  %v3413_v39 = vld [vmem:[#allocation8 + $0x200] ss:$16 sps:$4 sm:$0xff]   ;;  %v3416_v40 = vld [vmem:[#allocation8 + $0x208] ss:$16 sps:$4 sm:$0xff]  }
 0x1d7   :  { %2424 = vmatprep.subr.bf16.mxu0 %v3391_v41  ;;  %2510 = vmatprep.subr.bf16.mxu1 %v3394_v42  ;;  %v3421_v42 = vld [vmem:[#allocation8 + $0x224] ss:$16 sps:$4 sm:$0xff]  }
 0x1da   :  { %2425 = vmatpush1.bf16.msra.mxu0 %v3389_v43  ;;  %2511 = vmatpush1.bf16.msra.mxu1 %v3392_v44  ;;  %v3424_v43 = vld [vmem:[#allocation8 + $0x22c] ss:$16 sps:$4 sm:$0xff]   ;;  %v3419_v44 = vld [vmem:[#allocation8 + $0x220] ss:$16 sps:$4 sm:$0xff]  }
 0x1db   :  { %2426 = vmatprep.subr.bf16.mxu0 %v3397_v45  ;;  %2512 = vmatprep.subr.bf16.mxu1 %v3400_v46  ;;  %v3422_v45 = vld [vmem:[#allocation8 + $0x228] ss:$16 sps:$4 sm:$0xff]   ;;  %v3427_v46 = vld [vmem:[#allocation8 + $0x244] ss:$16 sps:$4 sm:$0xff]  }
 0x1de   :  { %2427 = vmatpush1.bf16.msra.mxu0 %v3395_v47  ;;  %2513 = vmatpush1.bf16.msra.mxu1 %v3398_v48  ;;  %v3430_v47 = vld [vmem:[#allocation8 + $0x24c] ss:$16 sps:$4 sm:$0xff]   ;;  %v3425_v48 = vld [vmem:[#allocation8 + $0x240] ss:$16 sps:$4 sm:$0xff]  }
 0x1df   :  { %2428 = vmatprep.subr.bf16.mxu0 %v3403_v49  ;;  %2514 = vmatprep.subr.bf16.mxu1 %v3406_v50  ;;  %v3428_v49 = vld [vmem:[#allocation8 + $0x248] ss:$16 sps:$4 sm:$0xff]   ;;  %v3433_v50 = vld [vmem:[#allocation8 + $0x264] ss:$16 sps:$4 sm:$0xff]  }
 0x1e2   :  { %2429 = vmatpush1.bf16.msra.mxu0 %v3401_v51  ;;  %2515 = vmatpush1.bf16.msra.mxu1 %v3404_v52  ;;  %v3436_v51 = vld [vmem:[#allocation8 + $0x26c] ss:$16 sps:$4 sm:$0xff]   ;;  %v3431_v52 = vld [vmem:[#allocation8 + $0x260] ss:$16 sps:$4 sm:$0xff]  }
 0x1e3   :  { %2430 = vmatprep.subr.bf16.mxu0 %v3409_v53  ;;  %2516 = vmatprep.subr.bf16.mxu1 %v3412_v54  ;;  %v3434_v53 = vld [vmem:[#allocation8 + $0x268] ss:$16 sps:$4 sm:$0xff]   ;;  %v3439_v54 = vld [vmem:[#allocation8 + $0x284] ss:$16 sps:$4 sm:$0xff]  }
 0x1e6   :  { %2431 = vmatpush1.bf16.msra.mxu0 %v3407_v55  ;;  %2517 = vmatpush1.bf16.msra.mxu1 %v3410_v56  ;;  %v3442_v55 = vld [vmem:[#allocation8 + $0x28c] ss:$16 sps:$4 sm:$0xff]   ;;  %v3437_v56 = vld [vmem:[#allocation8 + $0x280] ss:$16 sps:$4 sm:$0xff]  }
 0x1e7   :  { %2443 = vmatprep.subr.bf16.mxu0 %v3415_v57  ;;  %2529 = vmatprep.subr.bf16.mxu1 %v3418_v58  ;;  %v3440_v57 = vld [vmem:[#allocation8 + $0x288] ss:$16 sps:$4 sm:$0xff]   ;;  %v3445_v58 = vld [vmem:[#allocation8 + $0x2a4] ss:$16 sps:$4 sm:$0xff]  }
 0x27c   :  { %v1487_v0 = vpop.f32.mrb[4].mxu0  ;;  %v1573_v1 = vpop.f32.mrb[4].mxu1 }
 0x27d   :  { %v2986_v2 = vadd.f32 %v1487_v0, %v753_v60  ;;  %v2990_v3 = vadd.f32 %v1573_v1, %v761_v61  ;;  %v1489_v4 = vpop.f32.mrb[5].mxu0  ;;  %v1575_v5 = vpop.f32.mrb[5].mxu1  ;;  %v3449_v0 = vld [vmem:[#allocation8 + $0x2c0] ss:$16 sps:$4 sm:$0xff]   ;;  %v3452_v1 = vld [vmem:[#allocation8 + $0x2c8] ss:$16 sps:$4 sm:$0xff]  }
 0x27e   :  { %v2987_v7 = vadd.f32 %v1489_v4, %v757_v62  ;;  %v2991_v9 = vadd.f32 %v1575_v5, %v765_v63  ;;  %v1491_v10 = vpop.f32.mrb[6].mxu0  ;;  %v1577_v11 = vpop.f32.mrb[6].mxu1  ;;  %v3455_v4 = vld [vmem:[#allocation8 + $0x2e0] ss:$16 sps:$4 sm:$0xff]   ;;  %v3458_v5 = vld [vmem:[#allocation8 + $0x2e8] ss:$16 sps:$4 sm:$0xff]  }
 0x27f   :  { %vm1582_vm8 = vcmp.gt.f32.partialorder %v2986_v2, 0.0  ;;  %v1590_v12 = vmul.f32 0.2, %v2986_v2  ;;  %vm1584_vm9 = vcmp.gt.f32.partialorder %v2990_v3, 0.0  ;;  %v1592_v13 = vmul.f32 0.2, %v2990_v3 }
 0x280   :  { %vm1583_vm10 = vcmp.gt.f32.partialorder %v2987_v7, 0.0  ;;  %v1591_v14 = vmul.f32 0.2, %v2987_v7  ;;  %vm1585_vm11 = vcmp.gt.f32.partialorder %v2991_v9, 0.0  ;;  %v1593_v15 = vmul.f32 0.2, %v2991_v9 }
 0x281   :  { %v2988_v16 = vadd.f32 %v1491_v10, %v753_v60  ;;  %v2992_v17 = vadd.f32 %v1577_v11, %v761_v61  ;;  %v1493_v18 = vpop.f32.mrb[7].mxu0  ;;  %v1579_v19 = vpop.f32.mrb[7].mxu1  ;;  %v1598_v20 = vsel %vm1582_vm8, %v2986_v2, %v1590_v12  ;;  %v1600_v21 = vsel %vm1584_vm9, %v2990_v3, %v1592_v13  ;;  %v3443_v60 = vld [vmem:[#allocation8 + $0x2a0] ss:$16 sps:$4 sm:$0xff]   ;;  %v3446_v61 = vld [vmem:[#allocation8 + $0x2a8] ss:$16 sps:$4 sm:$0xff]  }
 0x282   :  { %v2989_v22 = vadd.f32 %v1493_v18, %v757_v62  ;;  %v2993_v23 = vadd.f32 %v1579_v19, %v765_v63  ;;  %v1599_v30 = vsel %vm1583_vm10, %v2987_v7, %v1591_v14  ;;  %v1601_v31 = vsel %vm1585_vm11, %v2991_v9, %v1593_v15  ;;  %v3451_v62 = vld [vmem:[#allocation8 + $0x2c4] ss:$16 sps:$4 sm:$0xff]   ;;  %v3454_v63 = vld [vmem:[#allocation8 + $0x2cc] ss:$16 sps:$4 sm:$0xff]   ;;  %v3461_v10 = vld [vmem:[#allocation8 + $0x300] ss:$16 sps:$4 sm:$0xff]  }
 0x283   :  { %vm1586_vm12 = vcmp.gt.f32.partialorder %v2988_v16, 0.0  ;;  %v1594_v24 = vmul.f32 0.2, %v2988_v16  ;;  %vm1588_vm13 = vcmp.gt.f32.partialorder %v2992_v17, 0.0  ;;  %v1596_v25 = vmul.f32 0.2, %v2992_v17 }
 0x284   :  { %vm1587_vm14 = vcmp.gt.f32.partialorder %v2989_v22, 0.0  ;;  %v1595_v26 = vmul.f32 0.2, %v2989_v22  ;;  %vm1589_vm15 = vcmp.gt.f32.partialorder %v2993_v23, 0.0  ;;  %v1597_v27 = vmul.f32 0.2, %v2993_v23 }
 0x285   :  { %v1602_v28 = vsel %vm1586_vm12, %v2988_v16, %v1594_v24  ;;  %v1604_v29 = vsel %vm1588_vm13, %v2992_v17, %v1596_v25  ;;  %v3457_v2 = vld [vmem:[#allocation8 + $0x2e4] ss:$16 sps:$4 sm:$0xff]   ;;  %v3460_v3 = vld [vmem:[#allocation8 + $0x2ec] ss:$16 sps:$4 sm:$0xff]   ;;  %v3464_v11 = vld [vmem:[#allocation8 + $0x308] ss:$16 sps:$4 sm:$0xff]  }
 0x286   :  { %v1606_v32 = vpack.c.bf16 %v1602_v28, %v1598_v20  ;;  %v3761_v33 = vpack.c.bf16 %v1604_v29, %v1600_v21  ;;  %v1603_v34 = vsel %vm1587_vm14, %v2989_v22, %v1595_v26  ;;  %v1605_v36 = vsel %vm1589_vm15, %v2993_v23, %v1597_v27  ;;  %v3463_v7 = vld [vmem:[#allocation8 + $0x304] ss:$16 sps:$4 sm:$0xff]   ;;  %v3466_v9 = vld [vmem:[#allocation8 + $0x30c] ss:$16 sps:$4 sm:$0xff]   ;;  %v3467_v14 = vld [vmem:[#allocation8 + $0x320] ss:$16 sps:$4 sm:$0xff]  }
 0x287   :  { %v1607_v37 = vpack.c.bf16 %v1603_v34, %v1599_v30  ;;  %v1609_v41 = vpack.c.bf16 %v1605_v36, %v1601_v31  ;;  %v3469_v12 = vld [vmem:[#allocation8 + $0x324] ss:$16 sps:$4 sm:$0xff]   ;;  %v3472_v13 = vld [vmem:[#allocation8 + $0x32c] ss:$16 sps:$4 sm:$0xff]   ;;  %v3470_v15 = vld [vmem:[#allocation8 + $0x328] ss:$16 sps:$4 sm:$0xff]  }
 0x288   :  { %v3475_v16 = vld [vmem:[#allocation8 + $0x344] ss:$16 sps:$4 sm:$0xff]   ;;  %v3478_v17 = vld [vmem:[#allocation8 + $0x34c] ss:$16 sps:$4 sm:$0xff]   ;;  %v3473_v18 = vld [vmem:[#allocation8 + $0x340] ss:$16 sps:$4 sm:$0xff]  }
 0x289   :  { %2432 = vmatprep.mubr.bf16.mxu0 %v1607_v37  ;;  %2518 = vmatprep.mubr.bf16.mxu1 %v1607_v37  ;;  %v3476_v19 = vld [vmem:[#allocation8 + $0x348] ss:$16 sps:$4 sm:$0xff]   ;;  %v3481_v20 = vld [vmem:[#allocation8 + $0x364] ss:$16 sps:$4 sm:$0xff]   ;;  %v3484_v21 = vld [vmem:[#allocation8 + $0x36c] ss:$16 sps:$4 sm:$0xff]  }
 0x28a   :  { %2433 = vmatmul.mubr.bf16.vlgmr.msra.gmra.mrb[8].mxu0 %v1606_v32  ;;  %2519 = vmatmul.mubr.bf16.vlgmr.msra.gmra.mrb[8].mxu1 %v1606_v32  ;;  %v3479_v22 = vld [vmem:[#allocation8 + $0x360] ss:$16 sps:$4 sm:$0xff]   ;;  %v3482_v23 = vld [vmem:[#allocation8 + $0x368] ss:$16 sps:$4 sm:$0xff]   ;;  %v3487_v24 = vld [vmem:[#allocation8 + $0x384] ss:$16 sps:$4 sm:$0xff]  }
 0x28b   :  { %2444 = vmatpush1.bf16.msra.mxu0 %v3413_v39  ;;  %2530 = vmatpush1.bf16.msra.mxu1 %v3416_v40  ;;  %v3490_v25 = vld [vmem:[#allocation8 + $0x38c] ss:$16 sps:$4 sm:$0xff]   ;;  %v3485_v26 = vld [vmem:[#allocation8 + $0x380] ss:$16 sps:$4 sm:$0xff]   ;;  %v3488_v27 = vld [vmem:[#allocation8 + $0x388] ss:$16 sps:$4 sm:$0xff]  }
 0x28c   :  { %2475 = vmatprep.mubr.bf16.mxu0 %v1609_v41  ;;  %2561 = vmatprep.mubr.bf16.mxu1 %v1609_v41  ;;  %v3493_v28 = vld [vmem:[#allocation8 + $0x3a4] ss:$16 sps:$4 sm:$0xff]   ;;  %v3496_v29 = vld [vmem:[#allocation8 + $0x3ac] ss:$16 sps:$4 sm:$0xff]   ;;  %v3491_v30 = vld [vmem:[#allocation8 + $0x3a0] ss:$16 sps:$4 sm:$0xff]  }
 0x28d   :  { %2445 = vmatprep.subr.bf16.mxu0 %v3421_v42  ;;  %2531 = vmatprep.subr.bf16.mxu1 %v3424_v43  ;;  %v3494_v31 = vld [vmem:[#allocation8 + $0x3a8] ss:$16 sps:$4 sm:$0xff]   ;;  %v3499_v32 = vld [vmem:[#allocation8 + $0x3c4] ss:$16 sps:$4 sm:$0xff]   ;;  %v3502_v34 = vld [vmem:[#allocation8 + $0x3cc] ss:$16 sps:$4 sm:$0xff]  }
 0x28e   :  { %v3497_v36 = vld [vmem:[#allocation8 + $0x3c0] ss:$16 sps:$4 sm:$0xff]   ;;  %v3500_v37 = vld [vmem:[#allocation8 + $0x3c8] ss:$16 sps:$4 sm:$0xff]   ;;  %v3505_v39 = vld [vmem:[#allocation8 + $0x3e4] ss:$16 sps:$4 sm:$0xff]  }
 0x28f   :  { %2446 = vmatpush1.bf16.msra.mxu0 %v3419_v44  ;;  %2532 = vmatpush1.bf16.msra.mxu1 %v3422_v45  ;;  %v3508_v40 = vld [vmem:[#allocation8 + $0x3ec] ss:$16 sps:$4 sm:$0xff]   ;;  %v3503_v41 = vld [vmem:[#allocation8 + $0x3e0] ss:$16 sps:$4 sm:$0xff]   ;;  %v3506_v42 = vld [vmem:[#allocation8 + $0x3e8] ss:$16 sps:$4 sm:$0xff]  }
 0x290   :  { %2447 = vmatprep.subr.bf16.mxu0 %v3427_v46  ;;  %2533 = vmatprep.subr.bf16.mxu1 %v3430_v47  ;;  %v1738_v43 = vld [vmem:[%s3796_s6] sm:$0xf]  ;;  %vm2652_vm8 = vcmask 7168  }
 0x291   :  { %v1743_v44 = vrot.slane %v1738_v43, %v3733_v6  ;;  %v1751_v45 = vrot.slane %v1738_v43, %v3742_v35  ;;  %v1747_v46 = vrot.slane %v1738_v43, %v3738_v8  ;;  %v1755_v47 = vrot.slane %v1738_v43, %v3744_v38 }
 0x293   :  { %2448 = vmatpush1.bf16.msra.mxu0 %v3425_v48  ;;  %2534 = vmatpush1.bf16.msra.mxu1 %v3428_v49  ;;  %v2596_v48 = vld [vmem:[%s3797_s7] sm:$0xf] }
 0x294   :  { %2449 = vmatprep.subr.bf16.mxu0 %v3433_v50  ;;  %2535 = vmatprep.subr.bf16.mxu1 %v3436_v51 }
 0x297   :  { %2450 = vmatpush1.bf16.msra.mxu0 %v3431_v52  ;;  %2536 = vmatpush1.bf16.msra.mxu1 %v3434_v53 }
 0x298   :  { %2451 = vmatprep.subr.bf16.mxu0 %v3439_v54  ;;  %2537 = vmatprep.subr.bf16.mxu1 %v3442_v55 }
 0x29b   :  { %2452 = vmatpush1.bf16.msra.mxu0 %v3437_v56  ;;  %2538 = vmatpush1.bf16.msra.mxu1 %v3440_v57  ;;  %v2601_v57 = vrot.slane %v2596_v48, %v3733_v6 }
 0x29c   :  { %2453 = vmatprep.subr.bf16.mxu0 %v3445_v58  ;;  %2539 = vmatprep.subr.bf16.mxu1 %v3448_v59  ;;  %v2609_v59 = vrot.slane %v2596_v48, %v3742_v35 }
 0x29f   :  { %2454 = vmatpush1.bf16.msra.mxu0 %v3443_v60  ;;  %2540 = vmatpush1.bf16.msra.mxu1 %v3446_v61  ;;  %v2605_v61 = vrot.slane %v2596_v48, %v3738_v8 }
 0x2a0   :  { %2455 = vmatprep.subr.bf16.mxu0 %v3451_v62  ;;  %2541 = vmatprep.subr.bf16.mxu1 %v3454_v63  ;;  %v2613_v62 = vrot.slane %v2596_v48, %v3744_v38 }
 0x2a3   :  { %2456 = vmatpush1.bf16.msra.mxu0 %v3449_v0  ;;  %2542 = vmatpush1.bf16.msra.mxu1 %v3452_v1 }
 0x2a4   :  { %2457 = vmatprep.subr.bf16.mxu0 %v3457_v2  ;;  %2543 = vmatprep.subr.bf16.mxu1 %v3460_v3 }
 0x2a7   :  { %2458 = vmatpush1.bf16.msra.mxu0 %v3455_v4  ;;  %2544 = vmatpush1.bf16.msra.mxu1 %v3458_v5 }
 0x2a8   :  { %2459 = vmatprep.subr.bf16.mxu0 %v3463_v7  ;;  %2545 = vmatprep.subr.bf16.mxu1 %v3466_v9 }
 0x2ab   :  { %2460 = vmatpush1.bf16.msra.mxu0 %v3461_v10  ;;  %2546 = vmatpush1.bf16.msra.mxu1 %v3464_v11 }
 0x2ac   :  { %2461 = vmatprep.subr.bf16.mxu0 %v3469_v12  ;;  %2547 = vmatprep.subr.bf16.mxu1 %v3472_v13 }
 0x2af   :  { %2462 = vmatpush1.bf16.msra.mxu0 %v3467_v14  ;;  %2548 = vmatpush1.bf16.msra.mxu1 %v3470_v15 }
 0x2b0   :  { %2463 = vmatprep.subr.bf16.mxu0 %v3475_v16  ;;  %2549 = vmatprep.subr.bf16.mxu1 %v3478_v17 }
 0x2b3   :  { %2464 = vmatpush1.bf16.msra.mxu0 %v3473_v18  ;;  %2550 = vmatpush1.bf16.msra.mxu1 %v3476_v19 }
 0x2b4   :  { %2465 = vmatprep.subr.bf16.mxu0 %v3481_v20  ;;  %2551 = vmatprep.subr.bf16.mxu1 %v3484_v21 }
 0x2b7   :  { %2466 = vmatpush1.bf16.msra.mxu0 %v3479_v22  ;;  %2552 = vmatpush1.bf16.msra.mxu1 %v3482_v23 }
 0x2b8   :  { %2467 = vmatprep.subr.bf16.mxu0 %v3487_v24  ;;  %2553 = vmatprep.subr.bf16.mxu1 %v3490_v25 }
 0x2bb   :  { %2468 = vmatpush1.bf16.msra.mxu0 %v3485_v26  ;;  %2554 = vmatpush1.bf16.msra.mxu1 %v3488_v27 }
 0x2bc   :  { %2469 = vmatprep.subr.bf16.mxu0 %v3493_v28  ;;  %2555 = vmatprep.subr.bf16.mxu1 %v3496_v29 }
 0x2bf   :  { %2470 = vmatpush1.bf16.msra.mxu0 %v3491_v30  ;;  %2556 = vmatpush1.bf16.msra.mxu1 %v3494_v31 }
 0x2c0   :  { %2471 = vmatprep.subr.bf16.mxu0 %v3499_v32  ;;  %2557 = vmatprep.subr.bf16.mxu1 %v3502_v34  ;;  %v2637_v32 = vstv %s3798_s8 }
 0x2c3   :  { %2472 = vmatpush1.bf16.msra.mxu0 %v3497_v36  ;;  %2558 = vmatpush1.bf16.msra.mxu1 %v3500_v37 }
 0x2c4   :  { %2473 = vmatprep.subr.bf16.mxu0 %v3505_v39  ;;  %2559 = vmatprep.subr.bf16.mxu1 %v3508_v40 }
 0x2c7   :  { %2474 = vmatpush1.bf16.msra.mxu0 %v3503_v41  ;;  %2560 = vmatpush1.bf16.msra.mxu1 %v3506_v42 }
 0x2ca   :  { %2476 = vmatmul.mubr.bf16.vlgmr.msra.gmra.mrb[8].mxu0 %v3761_v33  ;;  %2562 = vmatmul.mubr.bf16.vlgmr.msra.gmra.mrb[8].mxu1 %v3761_v33 }
 0x39d   :  { %v2477_v49 = vpop.f32.mrb[8].mxu0  ;;  %v2563_v50 = vpop.f32.mrb[8].mxu1 }
 0x39e   :  { %v2994_v51 = vadd.f32 %v2477_v49, %v1743_v44  ;;  %v2998_v33 = vadd.f32 %v2563_v50, %v1751_v45  ;;  %v2479_v52 = vpop.f32.mrb[9].mxu0  ;;  %v2565_v53 = vpop.f32.mrb[9].mxu1 }
 0x39f   :  { %v2995_v54 = vadd.f32 %v2479_v52, %v1747_v46  ;;  %v2999_v55 = vadd.f32 %v2565_v53, %v1755_v47  ;;  %v2481_v56 = vpop.f32.mrb[10].mxu0  ;;  %v2567_v58 = vpop.f32.mrb[10].mxu1 }
 0x3a0   :  { %vm2572_vm0 = vcmp.gt.f32.partialorder %v2994_v51, 0.0  ;;  %v2580_v60 = vmul.f32 0.2, %v2994_v51  ;;  %vm2574_vm1 = vcmp.gt.f32.partialorder %v2998_v33, 0.0  ;;  %v2582_v63 = vmul.f32 0.2, %v2998_v33 }
 0x3a1   :  { %vm2573_vm2 = vcmp.gt.f32.partialorder %v2995_v54, 0.0  ;;  %v2581_v0 = vmul.f32 0.2, %v2995_v54  ;;  %vm2575_vm3 = vcmp.gt.f32.partialorder %v2999_v55, 0.0  ;;  %v2583_v1 = vmul.f32 0.2, %v2999_v55 }
 0x3a2   :  { %v2996_v2 = vadd.f32 %v2481_v56, %v1743_v44  ;;  %v3000_v3 = vadd.f32 %v2567_v58, %v1751_v45  ;;  %v2483_v4 = vpop.f32.mrb[11].mxu0  ;;  %v2569_v5 = vpop.f32.mrb[11].mxu1  ;;  %v2588_v6 = vsel %vm2572_vm0, %v2994_v51, %v2580_v60  ;;  %v2590_v12 = vsel %vm2574_vm1, %v2998_v33, %v2582_v63 }
 0x3a3   :  { %v2589_v7 = vsel %vm2573_vm2, %v2995_v54, %v2581_v0  ;;  %v2997_v9 = vadd.f32 %v2483_v4, %v1747_v46  ;;  %v3001_v35 = vadd.f32 %v2569_v5, %v1755_v47  ;;  %v2618_v14 = vmul.f32 %v2601_v57, %v2588_v6 }
 0x3a4   :  { %vm2576_vm4 = vcmp.gt.f32.partialorder %v2996_v2, 0.0  ;;  %v2584_v10 = vmul.f32 0.2, %v2996_v2  ;;  %vm2578_vm5 = vcmp.gt.f32.partialorder %v3000_v3, 0.0  ;;  %v2586_v8 = vmul.f32 0.2, %v3000_v3 }
 0x3a5   :  { %vm2577_vm6 = vcmp.gt.f32.partialorder %v2997_v9, 0.0  ;;  %v2585_v38 = vmul.f32 0.2, %v2997_v9  ;;  %v2587_v11 = vmul.f32 0.2, %v3001_v35  ;;  %vm2579_vm7 = vcmp.gt.f32.partialorder %v3001_v35, 0.0 }
 0x3a6   :  { %v2592_v13 = vsel %vm2576_vm4, %v2996_v2, %v2584_v10  ;;  %v2619_v15 = vmul.f32 %v2605_v61, %v2589_v7  ;;  %v2594_v17 = vsel %vm2578_vm5, %v3000_v3, %v2586_v8  ;;  %v2591_v19 = vsel %vm2575_vm3, %v2999_v55, %v2583_v1 }
 0x3a7   :  { %v2622_v16 = vmul.f32 %v2601_v57, %v2592_v13  ;;  %v2593_v18 = vsel %vm2577_vm6, %v2997_v9, %v2585_v38  ;;  %v2620_v21 = vmul.f32 %v2609_v59, %v2590_v12  ;;  %v2595_v23 = vsel %vm2579_vm7, %v3001_v35, %v2587_v11 }
 0x3a8   :  { %v2623_v20 = vmul.f32 %v2605_v61, %v2593_v18  ;;  %v2626_v22 = vadd.f32 %v2619_v15, %v2618_v14  ;;  %v2621_v24 = vmul.f32 %v2613_v62, %v2591_v19  ;;  %v2624_v26 = vmul.f32 %v2609_v59, %v2594_v17 }
 0x3a9   :  { %v2625_v29 = vmul.f32 %v2613_v62, %v2595_v23 }
 0x3aa   :  { %v2627_v25 = vadd.f32 %v2626_v22, %v2620_v21  ;;  %v2631_v27 = vadd.f32 %v2623_v20, %v2622_v16 }
 0x3ac   :  { %v2628_v28 = vadd.f32 %v2627_v25, %v2621_v24  ;;  %v2632_v30 = vadd.f32 %v2631_v27, %v2624_v26 }
 0x3ae   :  { %2629 = vadd.xlane.f32.xlu0 %v2628_v28  ;;  %v2633_v31 = vadd.f32 %v2632_v30, %v2625_v29 }
 0x3b2   :  { %2634 = vadd.xlane.f32.xlu0 %v2633_v31 }
 0x43b   :  { %v2630_v34 = vpop.xlane.xlu0 %2629 }
 0x43c   :  { %v2638_v36 = vadd.f32 %v2637_v32, %v2630_v34 }
 0x43e   :  { %v2984_v37 = vmul.f32 -1.442695, %v2638_v36 }
 0x43f   :  { %v2635_v39 = vpop.xlane.xlu0 %2634 }
 0x440   :  { %3509 = vpow2.f32 %v2984_v37  ;;  %v2639_v40 = vadd.f32 %v2637_v32, %v2635_v39 }
 0x442   :  { %v2985_v41 = vmul.f32 -1.442695, %v2639_v40 }
 0x444   :  { %3511 = vpow2.f32 %v2985_v41 }
 0x44a   :  { %v3510_v42 = vpop.eup %3509 }
 0x44b   :  { %v2646_v43 = vadd.f32 1.0, %v3510_v42 }
 0x44d   :  { %3513 = vrcp.f32 %v2646_v43 }
 0x44e   :  { %v3512_v44 = vpop.eup %3511 }
 0x44f   :  { %v2647_v45 = vadd.f32 1.0, %v3512_v44 }
 0x451   :  { %3515 = vrcp.f32 %v2647_v45 }
 0x457   :  { %v3514_v46 = vpop.eup %3513 }
 0x458   :  { %2653 = vst.msk [vmem:[%s3799_s9] sm:$0xff] %vm2652_vm8, %v3514_v46 }
 0x45b   :  { %v3516_v47 = vpop.eup %3515 }
 0x45c   :  { %2654 = vst.msk [vmem:[%s3799_s9 + $0x8] sm:$0xff] %vm2652_vm8, %v3516_v47 }
 0x45d   :  { %2659 = vsyncpa [#allocation4], 1 }
 0x45e   :  { %2660 = vsyncpa [#allocation6], 1 }
 0x45f   :  { %2661 = vsyncpa [#allocation9], 1 }

</bundles_post_ra>
